<compile_context>
chip_gen: v7x
topology: tpu7x:2x2x1
jax: 0.10.0
libtpu: 0.0.40
codegen_flags: <defaults>
</compile_context>

<pallas_src>
import jax
import jax.numpy as jnp
from jax import lax
from jax.experimental import pallas as pl
from jax.experimental.pallas import tpu as pltpu


# ----------------------------------------------------------------------------
# 3x3 "same" conv on the W-split layout.
#
# True activation u[oh, ow, c]; split buffers P_dw hold columns ow = 2*j + dw at
# padded column (_PAD_W + j).  For output parity dw the three kw taps read from
# (source parity, padded-W tap offset a), tap column = _PAD_W - 1 + a + j:
#   dw=0:  kw=0 -> (P1, a=0)   kw=1 -> (P0, a=1)   kw=2 -> (P1, a=1)
#   dw=1:  kw=0 -> (P0, a=1)   kw=1 -> (P1, a=1)   kw=2 -> (P0, a=2)
# ----------------------------------------------------------------------------
_W_TAPS = (((1, 0), (0, 1), (1, 1)),
           ((0, 1), (1, 1), (0, 2)))
_SLAB_KEYS = ((1, 0), (0, 1), (1, 1), (0, 2))
_PAD_W = 8   # left W-pad of the scratch: interior fill starts sublane-aligned


def _conv3x3_wsplit(p0_ref, p1_ref, patch_ref, w_ref, kh_base):
    """One im2col MXU matmul for the 3x3 conv on the W-split padded scratch.

    p0_ref/p1_ref: (Hs, Wp+16, C) bf16; interior columns [8, 8+Wp); columns 7 and
                   8+Wp are the zero W-padding.  Row (kh_base + r + kh) holds the
                   activation row needed by output-local row r, tap kh.
    patch_ref:     (2, ht, Wp, 9*C) bf16 im2col scratch (both W parities).
    w_ref:         (9*C, Cout) bf16; row index = (kh*3+kw)*C + c.
    Returns the f32 conv output (2*ht*Wp, Cout); row dw*ht*Wp + r*Wp + j is the
    output at (local row r, ow = 2*j + dw)."""
    refs = (p0_ref, p1_ref)
    _, ht, wp, _ = patch_ref.shape
    c = p0_ref.shape[2]
    # 4 distinct (parity, W-shift) slabs; every tap is then a free leading-dim slice.
    slabs = {k: refs[k[0]][:, _PAD_W - 1 + k[1]:_PAD_W - 1 + k[1] + wp, :]
             for k in _SLAB_KEYS}
    for dw in (0, 1):
        for kh in range(3):
            for kw in range(3):
                tap = kh * 3 + kw
                piece = slabs[_W_TAPS[dw][kw]][kh_base + kh:kh_base + kh + ht]
                patch_ref[dw, :, :, tap * c:(tap + 1) * c] = piece
    patch = patch_ref[...].reshape(2 * ht * wp, 9 * c)
    return jnp.dot(patch, w_ref[...], preferred_element_type=jnp.float32)


def _emit_stats(out_f32, ssum_ref, ssq_ref):
    ssum_ref[0, 0] = jnp.sum(out_f32, axis=0, keepdims=True)
    ssq_ref[0, 0] = jnp.sum(out_f32 * out_f32, axis=0, keepdims=True)


# ----------------------------------------------------------------------------
# Stage 1: MaxUnpool2d(2,2) + conv1 + BN1 partial statistics (fused, H-tiled).
# ----------------------------------------------------------------------------
def _unpool_conv1_kernel(x_ref, idx_ref, w_ref, y_ref, ssum_ref, ssq_ref,
                         p0_ref, p1_ref, patch_ref):
    # x_ref/idx_ref: (1, Hp+2, Wp, Cin)  whole pooled image, H-padded by 1 row each side
    # w_ref        : (9*Cin, Cmid) bf16
    # y_ref        : (1, 2, ht*Wp, Cmid) bf16   conv1 pre-BN output for this tile
    # ssum/ssq     : (1, 1, 1, Cmid) f32        BN1 partials for this (n, t)
    # p0/p1        : (ht+4, Wp+16, Cin) bf16    rows <-> unpooled rows [t*ht-2, t*ht+ht+1]
    # patch_ref    : (2, ht, Wp, 9*Cin) bf16    im2col scratch
    t = pl.program_id(1)
    hs = p0_ref.shape[0]
    ht = hs - 4
    hpt = ht // 2
    hpw = hpt + 2
    wp = x_ref.shape[2]
    cin = x_ref.shape[3]
    mt = ht * wp
    wo = 2 * wp

    # pooled-row window for this tile + 1 halo pooled row each side (always a valid
    # slice thanks to the wrapper-side 1-row zero pad of the pooled input).
    r0 = t * hpt
    xw = x_ref[0, pl.ds(r0, hpw), :, :]               # (hpw, Wp, Cin) f32
    idxw = idx_ref[0, pl.ds(r0, hpw), :, :]           # (hpw, Wp, Cin) i32

    ih = lax.broadcasted_iota(jnp.int32, (hpw, wp, cin), 0) + (r0 - 1)  # global pooled row
    iw = lax.broadcasted_iota(jnp.int32, (hpw, wp, cin), 1)             # global pooled col

    zero_cols = jnp.zeros((hs, _PAD_W, cin), jnp.bfloat16)
    for dw, p_ref in ((0, p0_ref), (1, p1_ref)):
        # MaxUnpool2d(2,2): each pooled value lands at its recorded argmax position
        # inside its own 2x2 window (true for MaxPool2d(2,2) indices); rest is zero.
        rows = [jnp.where(idxw == (2 * ih + dh) * wo + (2 * iw + dw), xw, 0.0)
                for dh in (0, 1)]
        u = jnp.stack(rows, axis=1).reshape(hs, wp, cin)   # interleave rows 2i / 2i+1
        p_ref[:, _PAD_W:_PAD_W + wp, :] = u.astype(jnp.bfloat16)
        p_ref[:, 0:_PAD_W, :] = zero_cols                      # zero W border (left)
        p_ref[:, _PAD_W + wp:2 * _PAD_W + wp, :] = zero_cols   # zero W border (right)

    out = _conv3x3_wsplit(p0_ref, p1_ref, patch_ref, w_ref, kh_base=1)
    y_ref[0, 0] = out[:mt].astype(y_ref.dtype)
    y_ref[0, 1] = out[mt:].astype(y_ref.dtype)
    _emit_stats(out, ssum_ref, ssq_ref)


# ----------------------------------------------------------------------------
# Stage 2: BN1-apply + ReLU + conv2 + BN2 partial statistics (fused, H-tiled).
# ----------------------------------------------------------------------------
def _bnrelu_conv2_kernel(y_in_ref, sc_ref, sh_ref, w_ref, y_ref, ssum_ref, ssq_ref,
                         p0_ref, p1_ref, patch_ref):
    # y_in_ref: (2, Ho, Wp, Cmid) bf16  whole-image conv1 output (pre-BN, W-split)
    # sc/sh   : (1, 1, Cmid) f32        folded BN1 scale / shift
    # w_ref   : (9*Cmid, Cout) bf16
    # y_ref   : (1, 2, ht*Wp, Cout) bf16   conv2 pre-BN output for this tile
    # ssum/ssq: (1, 1, 1, Cout) f32
    # p0/p1   : (ht+2, Wp+16, Cmid) bf16   rows <-> output rows [t*ht-1, t*ht+ht]
    # patch   : (2, ht, Wp, 9*Cmid) bf16
    t = pl.program_id(1)
    hs = p0_ref.shape[0]
    ht = hs - 2
    ho = y_in_ref.shape[1]
    wp = y_in_ref.shape[2]
    cmid = y_in_ref.shape[3]
    mt = ht * wp

    scale = sc_ref[...]                               # (1, 1, Cmid)
    shift = sh_ref[...]
    r0 = t * ht
    r_top = jnp.maximum(r0 - 1, 0)
    r_bot = jnp.minimum(r0 + ht, ho - 1)
    m_top = jnp.where(t > 0, 1.0, 0.0).astype(jnp.float32)          # zero halo at image top
    m_bot = jnp.where(r0 + ht < ho, 1.0, 0.0).astype(jnp.float32)   # zero halo at image bottom

    def bn_relu(rows):
        return jnp.maximum(rows.astype(jnp.float32) * scale + shift, 0.0)

    zero_cols = jnp.zeros((hs, _PAD_W, cmid), jnp.bfloat16)
    for dw, p_ref in ((0, p0_ref), (1, p1_ref)):
        mid = bn_relu(y_in_ref[dw, pl.ds(r0, ht), :, :])             # (ht, Wp, Cmid)
        top = bn_relu(y_in_ref[dw, pl.ds(r_top, 1), :, :]) * m_top   # (1, Wp, Cmid)
        bot = bn_relu(y_in_ref[dw, pl.ds(r_bot, 1), :, :]) * m_bot
        p_ref[0:1, _PAD_W:_PAD_W + wp, :] = top.astype(jnp.bfloat16)
        p_ref[1:1 + ht, _PAD_W:_PAD_W + wp, :] = mid.astype(jnp.bfloat16)
        p_ref[1 + ht:2 + ht, _PAD_W:_PAD_W + wp, :] = bot.astype(jnp.bfloat16)
        p_ref[:, 0:_PAD_W, :] = zero_cols
        p_ref[:, _PAD_W + wp:2 * _PAD_W + wp, :] = zero_cols

    out = _conv3x3_wsplit(p0_ref, p1_ref, patch_ref, w_ref, kh_base=0)
    y_ref[0, 0] = out[:mt].astype(y_ref.dtype)
    y_ref[0, 1] = out[mt:].astype(y_ref.dtype)
    _emit_stats(out, ssum_ref, ssq_ref)


# ----------------------------------------------------------------------------
# Glue (small tensors only): fold batch statistics into per-channel scale/shift.
# ----------------------------------------------------------------------------
def _bn_affine_from_stats(psum, psumsq, gamma, beta, count, eps=1e-5):
    s = jnp.sum(psum, axis=(0, 1, 2))                 # (C,)
    q = jnp.sum(psumsq, axis=(0, 1, 2))
    mean = s / count
    var = jnp.maximum(q / count - mean * mean, 0.0)   # biased var (PyTorch BN, training)
    scale = gamma / jnp.sqrt(var + eps)
    shift = beta - mean * scale
    return scale.astype(jnp.float32), shift.astype(jnp.float32)


def _pick_tile_rows(ho, max_rows=32):
    best = 2
    for cand in range(2, min(ho, max_rows) + 1, 2):
        if ho % cand == 0:
            best = cand
    return best


def _vmem_limit(per_step_bytes):
    # double-buffered blocks + headroom, clamped under v7x's 64 MiB per-core VMEM.
    return int(min(max(3 * per_step_bytes + (4 << 20), 16 << 20), 56 << 20))


# ----------------------------------------------------------------------------
# segnetUp2.forward
# ----------------------------------------------------------------------------
def segnet_up2_forward(params, x_nchw, indices_nchw, output_shape, *, ht=None, eps=1e-5):
    """x_nchw, indices_nchw: (N, C_in, Hp, Wp); output_shape: (N, C_in, Ho, Wo)."""
    N, Cin, Hp, Wp = x_nchw.shape
    Ho, Wo = int(output_shape[2]), int(output_shape[3])
    assert Ho == 2 * Hp and Wo == 2 * Wp
    assert Wp % 8 == 0, "pooled width must be a multiple of 8 (sublane tiling)"
    Cmid = params["w1"].shape[0]
    Cout = params["w2"].shape[0]

    if ht is None:
        ht = _pick_tile_rows(Ho)
    assert ht >= 2 and ht % 2 == 0 and Ho % ht == 0
    T = Ho // ht
    Mt = ht * Wp
    M = Ho * Wp
    wpad = Wp + 2 * _PAD_W

    # ---- layout glue (pooled-resolution inputs / weights only) ----
    x = jnp.transpose(x_nchw, (0, 2, 3, 1))                        # NCHW -> NHWC
    idx = jnp.transpose(indices_nchw, (0, 2, 3, 1)).astype(jnp.int32)
    # 1-row zero pad at the pooled level: every tile's halo window becomes a valid slice.
    x = jnp.pad(x, ((0, 0), (1, 1), (0, 0), (0, 0)))
    idx = jnp.pad(idx, ((0, 0), (1, 1), (0, 0), (0, 0)), constant_values=-1)
    # PyTorch (Cout, Cin, kh, kw) -> row index (kh*3+kw)*Cin + cin, bf16 for the MXU.
    w1 = jnp.transpose(params["w1"], (2, 3, 1, 0)).reshape(9 * Cin, Cmid).astype(jnp.bfloat16)
    w2 = jnp.transpose(params["w2"], (2, 3, 1, 0)).reshape(9 * Cmid, Cout).astype(jnp.bfloat16)
    # conv biases b1/b2 intentionally unused: training-mode BN cancels them exactly.

    # ---- stage 1: unpool + conv1 + BN1 partial stats ----
    s1_est = ((Hp + 2) * Wp * Cin * 8 + 9 * Cin * Cmid * 2 + 2 * Mt * Cmid * 2
              + 2 * (ht + 4) * wpad * Cin * 2 + 2 * Mt * 9 * Cin * 2 + 2 * Mt * Cmid * 4)
    y1, s1, q1 = pl.pallas_call(
        _unpool_conv1_kernel,
        out_shape=(jax.ShapeDtypeStruct((N, 2, M, Cmid), jnp.bfloat16),
                   jax.ShapeDtypeStruct((N, T, 1, Cmid), jnp.float32),
                   jax.ShapeDtypeStruct((N, T, 1, Cmid), jnp.float32)),
        grid=(N, T),
        in_specs=[pl.BlockSpec((1, Hp + 2, Wp, Cin), lambda n, t: (n, 0, 0, 0)),
                  pl.BlockSpec((1, Hp + 2, Wp, Cin), lambda n, t: (n, 0, 0, 0)),
                  pl.BlockSpec((9 * Cin, Cmid), lambda n, t: (0, 0))],
        out_specs=(pl.BlockSpec((1, 2, Mt, Cmid), lambda n, t: (n, 0, t, 0)),
                   pl.BlockSpec((1, 1, 1, Cmid), lambda n, t: (n, t, 0, 0)),
                   pl.BlockSpec((1, 1, 1, Cmid), lambda n, t: (n, t, 0, 0))),
        scratch_shapes=[pltpu.VMEM((ht + 4, wpad, Cin), jnp.bfloat16),
                        pltpu.VMEM((ht + 4, wpad, Cin), jnp.bfloat16),
                        pltpu.VMEM((2, ht, Wp, 9 * Cin), jnp.bfloat16)],
        compiler_params=pltpu.CompilerParams(
            dimension_semantics=("parallel", "parallel"),
            vmem_limit_bytes=_vmem_limit(s1_est)),
    )(x, idx, w1)

    scale1, shift1 = _bn_affine_from_stats(s1, q1, params["g1"], params["be1"],
                                           N * Ho * Wo, eps)

    # ---- stage 2: BN1 + ReLU + conv2 + BN2 partial stats ----
    y1_sp = y1.reshape(N * 2, Ho, Wp, Cmid)          # metadata-only reshape
    s2_est = (2 * Ho * Wp * Cmid * 2 + 9 * Cmid * Cout * 2 + 2 * Mt * Cout * 2
              + 2 * (ht + 2) * wpad * Cmid * 2 + 2 * Mt * 9 * Cmid * 2 + 2 * Mt * Cout * 4)
    y2, s2, q2 = pl.pallas_call(
        _bnrelu_conv2_kernel,
        out_shape=(jax.ShapeDtypeStruct((N, 2, M, Cout), jnp.bfloat16),
                   jax.ShapeDtypeStruct((N, T, 1, Cout), jnp.float32),
                   jax.ShapeDtypeStruct((N, T, 1, Cout), jnp.float32)),
        grid=(N, T),
        in_specs=[pl.BlockSpec((2, Ho, Wp, Cmid), lambda n, t: (n, 0, 0, 0)),
                  pl.BlockSpec((1, 1, Cmid), lambda n, t: (0, 0, 0)),
                  pl.BlockSpec((1, 1, Cmid), lambda n, t: (0, 0, 0)),
                  pl.BlockSpec((9 * Cmid, Cout), lambda n, t: (0, 0))],
        out_specs=(pl.BlockSpec((1, 2, Mt, Cout), lambda n, t: (n, 0, t, 0)),
                   pl.BlockSpec((1, 1, 1, Cout), lambda n, t: (n, t, 0, 0)),
                   pl.BlockSpec((1, 1, 1, Cout), lambda n, t: (n, t, 0, 0))),
        scratch_shapes=[pltpu.VMEM((ht + 2, wpad, Cmid), jnp.bfloat16),
                        pltpu.VMEM((ht + 2, wpad, Cmid), jnp.bfloat16),
                        pltpu.VMEM((2, ht, Wp, 9 * Cmid), jnp.bfloat16)],
        compiler_params=pltpu.CompilerParams(
            dimension_semantics=("parallel", "parallel"),
            vmem_limit_bytes=_vmem_limit(s2_est)),
    )(y1_sp, scale1.reshape(1, 1, Cmid), shift1.reshape(1, 1, Cmid), w2)

    scale2, shift2 = _bn_affine_from_stats(s2, q2, params["g2"], params["be2"],
                                           N * Ho * Wo, eps)

    # ---- BN2 + ReLU + W-unsplit + NCHW, as plain jnp: XLA fuses the elementwise op
    #      into the closing transpose (replaces the previous stage-3 pallas_call). ----
    out = jnp.maximum(y2.astype(jnp.float32) * scale2.reshape(1, 1, 1, Cout)
                      + shift2.reshape(1, 1, 1, Cout), 0.0)
    out = out.reshape(N, 2, Ho, Wp, Cout)
    out = jnp.transpose(out, (0, 4, 2, 3, 1)).reshape(N, Cout, Ho, Wo)
    return out


# ----------------------------------------------------------------------------
# Pure-jnp reference (XLA) of segnetUp2.forward with training-mode BatchNorm.
# ----------------------------------------------------------------------------
def _reference_forward(params, x_nchw, indices_nchw, output_shape, eps=1e-5):
    N, Cin, Hp, Wp = x_nchw.shape
    Ho, Wo = int(output_shape[2]), int(output_shape[3])
    u = jnp.zeros((N, Cin, Ho * Wo), x_nchw.dtype)
    flat_idx = indices_nchw.reshape(N, Cin, Hp * Wp)
    flat_val = x_nchw.reshape(N, Cin, Hp * Wp)
    u = jax.vmap(jax.vmap(lambda b, i, v: b.at[i].set(v)))(u, flat_idx, flat_val)
    u = u.reshape(N, Cin, Ho, Wo)

    def cbr(a, w, b, g, be):
        y = lax.conv_general_dilated(a, w, (1, 1), ((1, 1), (1, 1)),
                                     dimension_numbers=("NCHW", "OIHW", "NCHW"),
                                     precision=lax.Precision.HIGHEST)
        y = y + b.reshape(1, -1, 1, 1)
        mean = jnp.mean(y, axis=(0, 2, 3), keepdims=True)
        var = jnp.mean((y - mean) ** 2, axis=(0, 2, 3), keepdims=True)
        yn = (y - mean) / jnp.sqrt(var + eps) * g.reshape(1, -1, 1, 1) + be.reshape(1, -1, 1, 1)
        return jnp.maximum(yn, 0.0)

    a1 = cbr(u, params["w1"], params["b1"], params["g1"], params["be1"])
    return cbr(a1, params["w2"], params["b2"], params["g2"], params["be2"])


def init_params(key, in_size, out_size):
    ks = jax.random.split(key, 6)
    return {
        "w1": 0.1 * jax.random.normal(ks[0], (in_size, in_size, 3, 3), jnp.float32),
        "b1": 0.01 * jnp.arange(in_size, dtype=jnp.float32),   # cancelled by BN (train)
        "g1": 1.0 + 0.1 * jax.random.normal(ks[1], (in_size,), jnp.float32),
        "be1": 0.1 * jax.random.normal(ks[2], (in_size,), jnp.float32),
        "w2": 0.1 * jax.random.normal(ks[3], (out_size, in_size, 3, 3), jnp.float32),
        "b2": 0.01 * jnp.arange(out_size, dtype=jnp.float32),  # cancelled by BN (train)
        "g2": 1.0 + 0.1 * jax.random.normal(ks[4], (out_size,), jnp.float32),
        "be2": 0.1 * jax.random.normal(ks[5], (out_size,), jnp.float32),
    }


if __name__ == "__main__":
    N, in_size, out_size = 2, 4, 8
    Hp, Wp = 8, 8                        # pooled (input) spatial size
    Ho, Wo = 2 * Hp, 2 * Wp              # unpooled (output) spatial size
    output_shape = (N, in_size, Ho, Wo)

    key = jax.random.PRNGKey(0)
    kx, ki, kj, kp = jax.random.split(key, 4)

    x = jax.random.normal(kx, (N, in_size, Hp, Wp), jnp.float32)

    # Valid MaxPool2d(2,2) argmax indices: each pooled cell picks one position inside
    # its own 2x2 window, as a flat Ho*Wo index (PyTorch uses int64; int32 here).
    off_h = jax.random.randint(ki, (N, in_size, Hp, Wp), 0, 2)
    off_w = jax.random.randint(kj, (N, in_size, Hp, Wp), 0, 2)
    i_grid = jnp.arange(Hp).reshape(1, 1, Hp, 1)
    j_grid = jnp.arange(Wp).reshape(1, 1, 1, Wp)
    indices = ((2 * i_grid + off_h) * Wo + (2 * j_grid + off_w)).astype(jnp.int32)

    params = init_params(kp, in_size, out_size)

    out = segnet_up2_forward(params, x, indices, output_shape, ht=8)   # 2 H-tiles
    out = jax.block_until_ready(out)
    assert out.shape == (N, out_size, Ho, Wo)
    assert bool(jnp.all(jnp.isfinite(out)))

    ref = _reference_forward(params, x, indices, output_shape)
    err = float(jnp.max(jnp.abs(out - ref)))
    assert err < 1e-1, f"max abs error vs reference too large: {err}"
    print("KERNEL_OK")
</pallas_src>

<mosaic_0001>
module attributes {stable_mosaic.version = 11 : i64} {
  func.func @_unpool_conv1_kernel(%arg0: i32, %arg1: i32, %arg2: memref<1x10x8x4xf32, #tpu.memory_space<vmem>>, %arg3: memref<1x10x8x4xi32, #tpu.memory_space<vmem>>, %arg4: memref<36x4xbf16, #tpu.memory_space<vmem>>, %arg5: memref<1x2x64x4xbf16, #tpu.memory_space<vmem>>, %arg6: memref<1x1x1x4xf32, #tpu.memory_space<vmem>>, %arg7: memref<1x1x1x4xf32, #tpu.memory_space<vmem>>, %arg8: memref<12x24x4xbf16, #tpu.memory_space<vmem>>, %arg9: memref<12x24x4xbf16, #tpu.memory_space<vmem>>, %arg10: memref<2x8x8x36xbf16, #tpu.memory_space<vmem>>) attributes {dimension_semantics = [#tpu.dimension_semantics<parallel>, #tpu.dimension_semantics<parallel>], iteration_bounds = array<i64: 2, 2>, scalar_prefetch = 0 : i64, scratch_operands = 3 : i64, tpu.core_type = #tpu.core_type<tc>, window_params = [{transform_indices = @transform_0, window_bounds = array<i64: 1, 10, 8, 4>}, {transform_indices = @transform_1, window_bounds = array<i64: 1, 10, 8, 4>}, {pipeline_mode = #tpu.pipeline_mode<synchronous>, transform_indices = @transform_2, window_bounds = array<i64: 36, 4>}, {transform_indices = @transform_3, window_bounds = array<i64: 1, 2, 64, 4>}, {transform_indices = @transform_4, window_bounds = array<i64: 1, 1, 1, 4>}, {transform_indices = @transform_5, window_bounds = array<i64: 1, 1, 1, 4>}]} {
    %c4_i32 = arith.constant 4 : i32
    %0 = arith.muli %arg1, %c4_i32 : i32
    %c0 = arith.constant 0 : index
    %1 = arith.index_cast %0 : i32 to index
    %c0_0 = arith.constant 0 : index
    %c0_1 = arith.constant 0 : index
    %2 = vector.load %arg2[%c0, %1, %c0_0, %c0_1] : memref<1x10x8x4xf32, #tpu.memory_space<vmem>>, vector<1x6x8x4xf32>
    %3 = vector.shape_cast %2 : vector<1x6x8x4xf32> to vector<6x8x4xf32>
    %c0_2 = arith.constant 0 : index
    %4 = arith.index_cast %0 : i32 to index
    %c0_3 = arith.constant 0 : index
    %c0_4 = arith.constant 0 : index
    %5 = vector.load %arg3[%c0_2, %4, %c0_3, %c0_4] : memref<1x10x8x4xi32, #tpu.memory_space<vmem>>, vector<1x6x8x4xi32>
    %6 = vector.shape_cast %5 : vector<1x6x8x4xi32> to vector<6x8x4xi32>
    %7 = tpu.iota {dimensions = array<i32: 0>} : vector<6x8x4xi32>
    %c1_i32 = arith.constant 1 : i32
    %8 = arith.subi %0, %c1_i32 : i32
    %9 = vector.broadcast %8 : i32 to vector<6x8x4xi32>
    %10 = arith.addi %7, %9 : vector<6x8x4xi32>
    %11 = tpu.iota {dimensions = array<i32: 1>} : vector<6x8x4xi32>
    %cst = arith.constant 0.000000e+00 : bf16
    %12 = vector.broadcast %cst : bf16 to vector<12x8x4xbf16>
    %c2_i32 = arith.constant 2 : i32
    %13 = vector.broadcast %c2_i32 : i32 to vector<6x8x4xi32>
    %14 = arith.muli %13, %10 : vector<6x8x4xi32>
    %c0_i32 = arith.constant 0 : i32
    %15 = vector.broadcast %c0_i32 : i32 to vector<6x8x4xi32>
    %16 = arith.addi %14, %15 : vector<6x8x4xi32>
    %c16_i32 = arith.constant 16 : i32
    %17 = vector.broadcast %c16_i32 : i32 to vector<6x8x4xi32>
    %18 = arith.muli %16, %17 : vector<6x8x4xi32>
    %c2_i32_5 = arith.constant 2 : i32
    %19 = vector.broadcast %c2_i32_5 : i32 to vector<6x8x4xi32>
    %20 = arith.muli %19, %11 : vector<6x8x4xi32>
    %c0_i32_6 = arith.constant 0 : i32
    %21 = vector.broadcast %c0_i32_6 : i32 to vector<6x8x4xi32>
    %22 = arith.addi %20, %21 : vector<6x8x4xi32>
    %23 = arith.addi %18, %22 : vector<6x8x4xi32>
    %24 = arith.cmpi eq, %6, %23 : vector<6x8x4xi32>
    %cst_7 = arith.constant 0.000000e+00 : f32
    %25 = vector.broadcast %cst_7 : f32 to vector<6x8x4xf32>
    %26 = arith.select %24, %3, %25 : vector<6x8x4xi1>, vector<6x8x4xf32>
    %c2_i32_8 = arith.constant 2 : i32
    %27 = vector.broadcast %c2_i32_8 : i32 to vector<6x8x4xi32>
    %28 = arith.muli %27, %10 : vector<6x8x4xi32>
    %c1_i32_9 = arith.constant 1 : i32
    %29 = vector.broadcast %c1_i32_9 : i32 to vector<6x8x4xi32>
    %30 = arith.addi %28, %29 : vector<6x8x4xi32>
    %c16_i32_10 = arith.constant 16 : i32
    %31 = vector.broadcast %c16_i32_10 : i32 to vector<6x8x4xi32>
    %32 = arith.muli %30, %31 : vector<6x8x4xi32>
    %c2_i32_11 = arith.constant 2 : i32
    %33 = vector.broadcast %c2_i32_11 : i32 to vector<6x8x4xi32>
    %34 = arith.muli %33, %11 : vector<6x8x4xi32>
    %c0_i32_12 = arith.constant 0 : i32
    %35 = vector.broadcast %c0_i32_12 : i32 to vector<6x8x4xi32>
    %36 = arith.addi %34, %35 : vector<6x8x4xi32>
    %37 = arith.addi %32, %36 : vector<6x8x4xi32>
    %38 = arith.cmpi eq, %6, %37 : vector<6x8x4xi32>
    %cst_13 = arith.constant 0.000000e+00 : f32
    %39 = vector.broadcast %cst_13 : f32 to vector<6x8x4xf32>
    %40 = arith.select %38, %3, %39 : vector<6x8x4xi1>, vector<6x8x4xf32>
    %41 = vector.shape_cast %26 : vector<6x8x4xf32> to vector<6x1x8x4xf32>
    %42 = vector.shape_cast %40 : vector<6x8x4xf32> to vector<6x1x8x4xf32>
    %43 = tpu.concatenate %41, %42 in 1 : vector<6x1x8x4xf32>, vector<6x1x8x4xf32> -> vector<6x2x8x4xf32>
    %44 = vector.shape_cast %43 : vector<6x2x8x4xf32> to vector<12x8x4xf32>
    %45 = arith.truncf %44 : vector<12x8x4xf32> to vector<12x8x4xbf16>
    %c0_14 = arith.constant 0 : index
    %c8 = arith.constant 8 : index
    %c0_15 = arith.constant 0 : index
    %46 = vector.load %arg8[%c0_14, %c8, %c0_15] : memref<12x24x4xbf16, #tpu.memory_space<vmem>>, vector<12x8x4xbf16>
    tpu.vector_store %arg8[%c0_14, %c8, %c0_15], %45 {strides = array<i32>} : memref<12x24x4xbf16, #tpu.memory_space<vmem>>, vector<12x8x4xbf16>,
    %c0_16 = arith.constant 0 : index
    %c0_17 = arith.constant 0 : index
    %c0_18 = arith.constant 0 : index
    %47 = vector.load %arg8[%c0_16, %c0_17, %c0_18] : memref<12x24x4xbf16, #tpu.memory_space<vmem>>, vector<12x8x4xbf16>
    tpu.vector_store %arg8[%c0_16, %c0_17, %c0_18], %12 {strides = array<i32>} : memref<12x24x4xbf16, #tpu.memory_space<vmem>>, vector<12x8x4xbf16>,
    %c0_19 = arith.constant 0 : index
    %c16 = arith.constant 16 : index
    %c0_20 = arith.constant 0 : index
    %48 = vector.load %arg8[%c0_19, %c16, %c0_20] : memref<12x24x4xbf16, #tpu.memory_space<vmem>>, vector<12x8x4xbf16>
    tpu.vector_store %arg8[%c0_19, %c16, %c0_20], %12 {strides = array<i32>} : memref<12x24x4xbf16, #tpu.memory_space<vmem>>, vector<12x8x4xbf16>,
    %c2_i32_21 = arith.constant 2 : i32
    %49 = vector.broadcast %c2_i32_21 : i32 to vector<6x8x4xi32>
    %50 = arith.muli %49, %10 : vector<6x8x4xi32>
    %c0_i32_22 = arith.constant 0 : i32
    %51 = vector.broadcast %c0_i32_22 : i32 to vector<6x8x4xi32>
    %52 = arith.addi %50, %51 : vector<6x8x4xi32>
    %c16_i32_23 = arith.constant 16 : i32
    %53 = vector.broadcast %c16_i32_23 : i32 to vector<6x8x4xi32>
    %54 = arith.muli %52, %53 : vector<6x8x4xi32>
    %c2_i32_24 = arith.constant 2 : i32
    %55 = vector.broadcast %c2_i32_24 : i32 to vector<6x8x4xi32>
    %56 = arith.muli %55, %11 : vector<6x8x4xi32>
    %c1_i32_25 = arith.constant 1 : i32
    %57 = vector.broadcast %c1_i32_25 : i32 to vector<6x8x4xi32>
    %58 = arith.addi %56, %57 : vector<6x8x4xi32>
    %59 = arith.addi %54, %58 : vector<6x8x4xi32>
    %60 = arith.cmpi eq, %6, %59 : vector<6x8x4xi32>
    %cst_26 = arith.constant 0.000000e+00 : f32
    %61 = vector.broadcast %cst_26 : f32 to vector<6x8x4xf32>
    %62 = arith.select %60, %3, %61 : vector<6x8x4xi1>, vector<6x8x4xf32>
    %c2_i32_27 = arith.constant 2 : i32
    %63 = vector.broadcast %c2_i32_27 : i32 to vector<6x8x4xi32>
    %64 = arith.muli %63, %10 : vector<6x8x4xi32>
    %c1_i32_28 = arith.constant 1 : i32
    %65 = vector.broadcast %c1_i32_28 : i32 to vector<6x8x4xi32>
    %66 = arith.addi %64, %65 : vector<6x8x4xi32>
    %c16_i32_29 = arith.constant 16 : i32
    %67 = vector.broadcast %c16_i32_29 : i32 to vector<6x8x4xi32>
    %68 = arith.muli %66, %67 : vector<6x8x4xi32>
    %c2_i32_30 = arith.constant 2 : i32
    %69 = vector.broadcast %c2_i32_30 : i32 to vector<6x8x4xi32>
    %70 = arith.muli %69, %11 : vector<6x8x4xi32>
    %c1_i32_31 = arith.constant 1 : i32
    %71 = vector.broadcast %c1_i32_31 : i32 to vector<6x8x4xi32>
    %72 = arith.addi %70, %71 : vector<6x8x4xi32>
    %73 = arith.addi %68, %72 : vector<6x8x4xi32>
    %74 = arith.cmpi eq, %6, %73 : vector<6x8x4xi32>
    %cst_32 = arith.constant 0.000000e+00 : f32
    %75 = vector.broadcast %cst_32 : f32 to vector<6x8x4xf32>
    %76 = arith.select %74, %3, %75 : vector<6x8x4xi1>, vector<6x8x4xf32>
    %77 = vector.shape_cast %62 : vector<6x8x4xf32> to vector<6x1x8x4xf32>
    %78 = vector.shape_cast %76 : vector<6x8x4xf32> to vector<6x1x8x4xf32>
    %79 = tpu.concatenate %77, %78 in 1 : vector<6x1x8x4xf32>, vector<6x1x8x4xf32> -> vector<6x2x8x4xf32>
    %80 = vector.shape_cast %79 : vector<6x2x8x4xf32> to vector<12x8x4xf32>
    %81 = arith.truncf %80 : vector<12x8x4xf32> to vector<12x8x4xbf16>
    %c0_33 = arith.constant 0 : index
    %c8_34 = arith.constant 8 : index
    %c0_35 = arith.constant 0 : index
    %82 = vector.load %arg9[%c0_33, %c8_34, %c0_35] : memref<12x24x4xbf16, #tpu.memory_space<vmem>>, vector<12x8x4xbf16>
    tpu.vector_store %arg9[%c0_33, %c8_34, %c0_35], %81 {strides = array<i32>} : memref<12x24x4xbf16, #tpu.memory_space<vmem>>, vector<12x8x4xbf16>,
    %c0_36 = arith.constant 0 : index
    %c0_37 = arith.constant 0 : index
    %c0_38 = arith.constant 0 : index
    %83 = vector.load %arg9[%c0_36, %c0_37, %c0_38] : memref<12x24x4xbf16, #tpu.memory_space<vmem>>, vector<12x8x4xbf16>
    tpu.vector_store %arg9[%c0_36, %c0_37, %c0_38], %12 {strides = array<i32>} : memref<12x24x4xbf16, #tpu.memory_space<vmem>>, vector<12x8x4xbf16>,
    %c0_39 = arith.constant 0 : index
    %c16_40 = arith.constant 16 : index
    %c0_41 = arith.constant 0 : index
    %84 = vector.load %arg9[%c0_39, %c16_40, %c0_41] : memref<12x24x4xbf16, #tpu.memory_space<vmem>>, vector<12x8x4xbf16>
    tpu.vector_store %arg9[%c0_39, %c16_40, %c0_41], %12 {strides = array<i32>} : memref<12x24x4xbf16, #tpu.memory_space<vmem>>, vector<12x8x4xbf16>,
    %c0_42 = arith.constant 0 : index
    %c7 = arith.constant 7 : index
    %c0_43 = arith.constant 0 : index
    %85 = vector.load %arg9[%c0_42, %c7, %c0_43] : memref<12x24x4xbf16, #tpu.memory_space<vmem>>, vector<12x8x4xbf16>
    %c0_44 = arith.constant 0 : index
    %c8_45 = arith.constant 8 : index
    %c0_46 = arith.constant 0 : index
    %86 = vector.load %arg8[%c0_44, %c8_45, %c0_46] : memref<12x24x4xbf16, #tpu.memory_space<vmem>>, vector<12x8x4xbf16>
    %c0_47 = arith.constant 0 : index
    %c8_48 = arith.constant 8 : index
    %c0_49 = arith.constant 0 : index
    %87 = vector.load %arg9[%c0_47, %c8_48, %c0_49] : memref<12x24x4xbf16, #tpu.memory_space<vmem>>, vector<12x8x4xbf16>
    %c0_50 = arith.constant 0 : index
    %c9 = arith.constant 9 : index
    %c0_51 = arith.constant 0 : index
    %88 = vector.load %arg8[%c0_50, %c9, %c0_51] : memref<12x24x4xbf16, #tpu.memory_space<vmem>>, vector<12x8x4xbf16>
    %89 = vector.extract_strided_slice %85 {offsets = [1, 0, 0], sizes = [8, 8, 4], strides = [1, 1, 1]} : vector<12x8x4xbf16> to vector<8x8x4xbf16>
    %c0_52 = arith.constant 0 : index
    %c0_53 = arith.constant 0 : index
    %c0_54 = arith.constant 0 : index
    %c0_55 = arith.constant 0 : index
    %90 = vector.load %arg10[%c0_52, %c0_53, %c0_54, %c0_55] : memref<2x8x8x36xbf16, #tpu.memory_space<vmem>>, vector<1x8x8x4xbf16>
    %91 = vector.shape_cast %90 : vector<1x8x8x4xbf16> to vector<8x8x4xbf16>
    %92 = vector.shape_cast %89 : vector<8x8x4xbf16> to vector<1x8x8x4xbf16>
    tpu.vector_store %arg10[%c0_52, %c0_53, %c0_54, %c0_55], %92 {strides = array<i32>} : memref<2x8x8x36xbf16, #tpu.memory_space<vmem>>, vector<1x8x8x4xbf16>,
    %93 = vector.extract_strided_slice %86 {offsets = [1, 0, 0], sizes = [8, 8, 4], strides = [1, 1, 1]} : vector<12x8x4xbf16> to vector<8x8x4xbf16>
    %c0_56 = arith.constant 0 : index
    %c0_57 = arith.constant 0 : index
    %c0_58 = arith.constant 0 : index
    %c4 = arith.constant 4 : index
    %94 = vector.load %arg10[%c0_56, %c0_57, %c0_58, %c4] : memref<2x8x8x36xbf16, #tpu.memory_space<vmem>>, vector<1x8x8x4xbf16>
    %95 = vector.shape_cast %94 : vector<1x8x8x4xbf16> to vector<8x8x4xbf16>
    %96 = vector.shape_cast %93 : vector<8x8x4xbf16> to vector<1x8x8x4xbf16>
    tpu.vector_store %arg10[%c0_56, %c0_57, %c0_58, %c4], %96 {strides = array<i32>} : memref<2x8x8x36xbf16, #tpu.memory_space<vmem>>, vector<1x8x8x4xbf16>,
    %97 = vector.extract_strided_slice %87 {offsets = [1, 0, 0], sizes = [8, 8, 4], strides = [1, 1, 1]} : vector<12x8x4xbf16> to vector<8x8x4xbf16>
    %c0_59 = arith.constant 0 : index
    %c0_60 = arith.constant 0 : index
    %c0_61 = arith.constant 0 : index
    %c8_62 = arith.constant 8 : index
    %98 = vector.load %arg10[%c0_59, %c0_60, %c0_61, %c8_62] : memref<2x8x8x36xbf16, #tpu.memory_space<vmem>>, vector<1x8x8x4xbf16>
    %99 = vector.shape_cast %98 : vector<1x8x8x4xbf16> to vector<8x8x4xbf16>
    %100 = vector.shape_cast %97 : vector<8x8x4xbf16> to vector<1x8x8x4xbf16>
    tpu.vector_store %arg10[%c0_59, %c0_60, %c0_61, %c8_62], %100 {strides = array<i32>} : memref<2x8x8x36xbf16, #tpu.memory_space<vmem>>, vector<1x8x8x4xbf16>,
    %101 = vector.extract_strided_slice %85 {offsets = [2, 0, 0], sizes = [8, 8, 4], strides = [1, 1, 1]} : vector<12x8x4xbf16> to vector<8x8x4xbf16>
    %c0_63 = arith.constant 0 : index
    %c0_64 = arith.constant 0 : index
    %c0_65 = arith.constant 0 : index
    %c12 = arith.constant 12 : index
    %102 = vector.load %arg10[%c0_63, %c0_64, %c0_65, %c12] : memref<2x8x8x36xbf16, #tpu.memory_space<vmem>>, vector<1x8x8x4xbf16>
    %103 = vector.shape_cast %102 : vector<1x8x8x4xbf16> to vector<8x8x4xbf16>
    %104 = vector.shape_cast %101 : vector<8x8x4xbf16> to vector<1x8x8x4xbf16>
    tpu.vector_store %arg10[%c0_63, %c0_64, %c0_65, %c12], %104 {strides = array<i32>} : memref<2x8x8x36xbf16, #tpu.memory_space<vmem>>, vector<1x8x8x4xbf16>,
    %105 = vector.extract_strided_slice %86 {offsets = [2, 0, 0], sizes = [8, 8, 4], strides = [1, 1, 1]} : vector<12x8x4xbf16> to vector<8x8x4xbf16>
    %c0_66 = arith.constant 0 : index
    %c0_67 = arith.constant 0 : index
    %c0_68 = arith.constant 0 : index
    %c16_69 = arith.constant 16 : index
    %106 = vector.load %arg10[%c0_66, %c0_67, %c0_68, %c16_69] : memref<2x8x8x36xbf16, #tpu.memory_space<vmem>>, vector<1x8x8x4xbf16>
    %107 = vector.shape_cast %106 : vector<1x8x8x4xbf16> to vector<8x8x4xbf16>
    %108 = vector.shape_cast %105 : vector<8x8x4xbf16> to vector<1x8x8x4xbf16>
    tpu.vector_store %arg10[%c0_66, %c0_67, %c0_68, %c16_69], %108 {strides = array<i32>} : memref<2x8x8x36xbf16, #tpu.memory_space<vmem>>, vector<1x8x8x4xbf16>,
    %109 = vector.extract_strided_slice %87 {offsets = [2, 0, 0], sizes = [8, 8, 4], strides = [1, 1, 1]} : vector<12x8x4xbf16> to vector<8x8x4xbf16>
    %c0_70 = arith.constant 0 : index
    %c0_71 = arith.constant 0 : index
    %c0_72 = arith.constant 0 : index
    %c20 = arith.constant 20 : index
    %110 = vector.load %arg10[%c0_70, %c0_71, %c0_72, %c20] : memref<2x8x8x36xbf16, #tpu.memory_space<vmem>>, vector<1x8x8x4xbf16>
    %111 = vector.shape_cast %110 : vector<1x8x8x4xbf16> to vector<8x8x4xbf16>
    %112 = vector.shape_cast %109 : vector<8x8x4xbf16> to vector<1x8x8x4xbf16>
    tpu.vector_store %arg10[%c0_70, %c0_71, %c0_72, %c20], %112 {strides = array<i32>} : memref<2x8x8x36xbf16, #tpu.memory_space<vmem>>, vector<1x8x8x4xbf16>,
    %113 = vector.extract_strided_slice %85 {offsets = [3, 0, 0], sizes = [8, 8, 4], strides = [1, 1, 1]} : vector<12x8x4xbf16> to vector<8x8x4xbf16>
    %c0_73 = arith.constant 0 : index
    %c0_74 = arith.constant 0 : index
    %c0_75 = arith.constant 0 : index
    %c24 = arith.constant 24 : index
    %114 = vector.load %arg10[%c0_73, %c0_74, %c0_75, %c24] : memref<2x8x8x36xbf16, #tpu.memory_space<vmem>>, vector<1x8x8x4xbf16>
    %115 = vector.shape_cast %114 : vector<1x8x8x4xbf16> to vector<8x8x4xbf16>
    %116 = vector.shape_cast %113 : vector<8x8x4xbf16> to vector<1x8x8x4xbf16>
    tpu.vector_store %arg10[%c0_73, %c0_74, %c0_75, %c24], %116 {strides = array<i32>} : memref<2x8x8x36xbf16, #tpu.memory_space<vmem>>, vector<1x8x8x4xbf16>,
    %117 = vector.extract_strided_slice %86 {offsets = [3, 0, 0], sizes = [8, 8, 4], strides = [1, 1, 1]} : vector<12x8x4xbf16> to vector<8x8x4xbf16>
    %c0_76 = arith.constant 0 : index
    %c0_77 = arith.constant 0 : index
    %c0_78 = arith.constant 0 : index
    %c28 = arith.constant 28 : index
    %118 = vector.load %arg10[%c0_76, %c0_77, %c0_78, %c28] : memref<2x8x8x36xbf16, #tpu.memory_space<vmem>>, vector<1x8x8x4xbf16>
    %119 = vector.shape_cast %118 : vector<1x8x8x4xbf16> to vector<8x8x4xbf16>
    %120 = vector.shape_cast %117 : vector<8x8x4xbf16> to vector<1x8x8x4xbf16>
    tpu.vector_store %arg10[%c0_76, %c0_77, %c0_78, %c28], %120 {strides = array<i32>} : memref<2x8x8x36xbf16, #tpu.memory_space<vmem>>, vector<1x8x8x4xbf16>,
    %121 = vector.extract_strided_slice %87 {offsets = [3, 0, 0], sizes = [8, 8, 4], strides = [1, 1, 1]} : vector<12x8x4xbf16> to vector<8x8x4xbf16>
    %c0_79 = arith.constant 0 : index
    %c0_80 = arith.constant 0 : index
    %c0_81 = arith.constant 0 : index
    %c32 = arith.constant 32 : index
    %122 = vector.load %arg10[%c0_79, %c0_80, %c0_81, %c32] : memref<2x8x8x36xbf16, #tpu.memory_space<vmem>>, vector<1x8x8x4xbf16>
    %123 = vector.shape_cast %122 : vector<1x8x8x4xbf16> to vector<8x8x4xbf16>
    %124 = vector.shape_cast %121 : vector<8x8x4xbf16> to vector<1x8x8x4xbf16>
    tpu.vector_store %arg10[%c0_79, %c0_80, %c0_81, %c32], %124 {strides = array<i32>} : memref<2x8x8x36xbf16, #tpu.memory_space<vmem>>, vector<1x8x8x4xbf16>,
    %125 = vector.extract_strided_slice %86 {offsets = [1, 0, 0], sizes = [8, 8, 4], strides = [1, 1, 1]} : vector<12x8x4xbf16> to vector<8x8x4xbf16>
    %c1 = arith.constant 1 : index
    %c0_82 = arith.constant 0 : index
    %c0_83 = arith.constant 0 : index
    %c0_84 = arith.constant 0 : index
    %126 = vector.load %arg10[%c1, %c0_82, %c0_83, %c0_84] : memref<2x8x8x36xbf16, #tpu.memory_space<vmem>>, vector<1x8x8x4xbf16>
    %127 = vector.shape_cast %126 : vector<1x8x8x4xbf16> to vector<8x8x4xbf16>
    %128 = vector.shape_cast %125 : vector<8x8x4xbf16> to vector<1x8x8x4xbf16>
    tpu.vector_store %arg10[%c1, %c0_82, %c0_83, %c0_84], %128 {strides = array<i32>} : memref<2x8x8x36xbf16, #tpu.memory_space<vmem>>, vector<1x8x8x4xbf16>,
    %129 = vector.extract_strided_slice %87 {offsets = [1, 0, 0], sizes = [8, 8, 4], strides = [1, 1, 1]} : vector<12x8x4xbf16> to vector<8x8x4xbf16>
    %c1_85 = arith.constant 1 : index
    %c0_86 = arith.constant 0 : index
    %c0_87 = arith.constant 0 : index
    %c4_88 = arith.constant 4 : index
    %130 = vector.load %arg10[%c1_85, %c0_86, %c0_87, %c4_88] : memref<2x8x8x36xbf16, #tpu.memory_space<vmem>>, vector<1x8x8x4xbf16>
    %131 = vector.shape_cast %130 : vector<1x8x8x4xbf16> to vector<8x8x4xbf16>
    %132 = vector.shape_cast %129 : vector<8x8x4xbf16> to vector<1x8x8x4xbf16>
    tpu.vector_store %arg10[%c1_85, %c0_86, %c0_87, %c4_88], %132 {strides = array<i32>} : memref<2x8x8x36xbf16, #tpu.memory_space<vmem>>, vector<1x8x8x4xbf16>,
    %133 = vector.extract_strided_slice %88 {offsets = [1, 0, 0], sizes = [8, 8, 4], strides = [1, 1, 1]} : vector<12x8x4xbf16> to vector<8x8x4xbf16>
    %c1_89 = arith.constant 1 : index
    %c0_90 = arith.constant 0 : index
    %c0_91 = arith.constant 0 : index
    %c8_92 = arith.constant 8 : index
    %134 = vector.load %arg10[%c1_89, %c0_90, %c0_91, %c8_92] : memref<2x8x8x36xbf16, #tpu.memory_space<vmem>>, vector<1x8x8x4xbf16>
    %135 = vector.shape_cast %134 : vector<1x8x8x4xbf16> to vector<8x8x4xbf16>
    %136 = vector.shape_cast %133 : vector<8x8x4xbf16> to vector<1x8x8x4xbf16>
    tpu.vector_store %arg10[%c1_89, %c0_90, %c0_91, %c8_92], %136 {strides = array<i32>} : memref<2x8x8x36xbf16, #tpu.memory_space<vmem>>, vector<1x8x8x4xbf16>,
    %137 = vector.extract_strided_slice %86 {offsets = [2, 0, 0], sizes = [8, 8, 4], strides = [1, 1, 1]} : vector<12x8x4xbf16> to vector<8x8x4xbf16>
    %c1_93 = arith.constant 1 : index
    %c0_94 = arith.constant 0 : index
    %c0_95 = arith.constant 0 : index
    %c12_96 = arith.constant 12 : index
    %138 = vector.load %arg10[%c1_93, %c0_94, %c0_95, %c12_96] : memref<2x8x8x36xbf16, #tpu.memory_space<vmem>>, vector<1x8x8x4xbf16>
    %139 = vector.shape_cast %138 : vector<1x8x8x4xbf16> to vector<8x8x4xbf16>
    %140 = vector.shape_cast %137 : vector<8x8x4xbf16> to vector<1x8x8x4xbf16>
    tpu.vector_store %arg10[%c1_93, %c0_94, %c0_95, %c12_96], %140 {strides = array<i32>} : memref<2x8x8x36xbf16, #tpu.memory_space<vmem>>, vector<1x8x8x4xbf16>,
    %141 = vector.extract_strided_slice %87 {offsets = [2, 0, 0], sizes = [8, 8, 4], strides = [1, 1, 1]} : vector<12x8x4xbf16> to vector<8x8x4xbf16>
    %c1_97 = arith.constant 1 : index
    %c0_98 = arith.constant 0 : index
    %c0_99 = arith.constant 0 : index
    %c16_100 = arith.constant 16 : index
    %142 = vector.load %arg10[%c1_97, %c0_98, %c0_99, %c16_100] : memref<2x8x8x36xbf16, #tpu.memory_space<vmem>>, vector<1x8x8x4xbf16>
    %143 = vector.shape_cast %142 : vector<1x8x8x4xbf16> to vector<8x8x4xbf16>
    %144 = vector.shape_cast %141 : vector<8x8x4xbf16> to vector<1x8x8x4xbf16>
    tpu.vector_store %arg10[%c1_97, %c0_98, %c0_99, %c16_100], %144 {strides = array<i32>} : memref<2x8x8x36xbf16, #tpu.memory_space<vmem>>, vector<1x8x8x4xbf16>,
    %145 = vector.extract_strided_slice %88 {offsets = [2, 0, 0], sizes = [8, 8, 4], strides = [1, 1, 1]} : vector<12x8x4xbf16> to vector<8x8x4xbf16>
    %c1_101 = arith.constant 1 : index
    %c0_102 = arith.constant 0 : index
    %c0_103 = arith.constant 0 : index
    %c20_104 = arith.constant 20 : index
    %146 = vector.load %arg10[%c1_101, %c0_102, %c0_103, %c20_104] : memref<2x8x8x36xbf16, #tpu.memory_space<vmem>>, vector<1x8x8x4xbf16>
    %147 = vector.shape_cast %146 : vector<1x8x8x4xbf16> to vector<8x8x4xbf16>
    %148 = vector.shape_cast %145 : vector<8x8x4xbf16> to vector<1x8x8x4xbf16>
    tpu.vector_store %arg10[%c1_101, %c0_102, %c0_103, %c20_104], %148 {strides = array<i32>} : memref<2x8x8x36xbf16, #tpu.memory_space<vmem>>, vector<1x8x8x4xbf16>,
    %149 = vector.extract_strided_slice %86 {offsets = [3, 0, 0], sizes = [8, 8, 4], strides = [1, 1, 1]} : vector<12x8x4xbf16> to vector<8x8x4xbf16>
    %c1_105 = arith.constant 1 : index
    %c0_106 = arith.constant 0 : index
    %c0_107 = arith.constant 0 : index
    %c24_108 = arith.constant 24 : index
    %150 = vector.load %arg10[%c1_105, %c0_106, %c0_107, %c24_108] : memref<2x8x8x36xbf16, #tpu.memory_space<vmem>>, vector<1x8x8x4xbf16>
    %151 = vector.shape_cast %150 : vector<1x8x8x4xbf16> to vector<8x8x4xbf16>
    %152 = vector.shape_cast %149 : vector<8x8x4xbf16> to vector<1x8x8x4xbf16>
    tpu.vector_store %arg10[%c1_105, %c0_106, %c0_107, %c24_108], %152 {strides = array<i32>} : memref<2x8x8x36xbf16, #tpu.memory_space<vmem>>, vector<1x8x8x4xbf16>,
    %153 = vector.extract_strided_slice %87 {offsets = [3, 0, 0], sizes = [8, 8, 4], strides = [1, 1, 1]} : vector<12x8x4xbf16> to vector<8x8x4xbf16>
    %c1_109 = arith.constant 1 : index
    %c0_110 = arith.constant 0 : index
    %c0_111 = arith.constant 0 : index
    %c28_112 = arith.constant 28 : index
    %154 = vector.load %arg10[%c1_109, %c0_110, %c0_111, %c28_112] : memref<2x8x8x36xbf16, #tpu.memory_space<vmem>>, vector<1x8x8x4xbf16>
    %155 = vector.shape_cast %154 : vector<1x8x8x4xbf16> to vector<8x8x4xbf16>
    %156 = vector.shape_cast %153 : vector<8x8x4xbf16> to vector<1x8x8x4xbf16>
    tpu.vector_store %arg10[%c1_109, %c0_110, %c0_111, %c28_112], %156 {strides = array<i32>} : memref<2x8x8x36xbf16, #tpu.memory_space<vmem>>, vector<1x8x8x4xbf16>,
    %157 = vector.extract_strided_slice %88 {offsets = [3, 0, 0], sizes = [8, 8, 4], strides = [1, 1, 1]} : vector<12x8x4xbf16> to vector<8x8x4xbf16>
    %c1_113 = arith.constant 1 : index
    %c0_114 = arith.constant 0 : index
    %c0_115 = arith.constant 0 : index
    %c32_116 = arith.constant 32 : index
    %158 = vector.load %arg10[%c1_113, %c0_114, %c0_115, %c32_116] : memref<2x8x8x36xbf16, #tpu.memory_space<vmem>>, vector<1x8x8x4xbf16>
    %159 = vector.shape_cast %158 : vector<1x8x8x4xbf16> to vector<8x8x4xbf16>
    %160 = vector.shape_cast %157 : vector<8x8x4xbf16> to vector<1x8x8x4xbf16>
    tpu.vector_store %arg10[%c1_113, %c0_114, %c0_115, %c32_116], %160 {strides = array<i32>} : memref<2x8x8x36xbf16, #tpu.memory_space<vmem>>, vector<1x8x8x4xbf16>,
    %c0_117 = arith.constant 0 : index
    %c0_118 = arith.constant 0 : index
    %c0_119 = arith.constant 0 : index
    %c0_120 = arith.constant 0 : index
    %161 = vector.load %arg10[%c0_117, %c0_118, %c0_119, %c0_120] : memref<2x8x8x36xbf16, #tpu.memory_space<vmem>>, vector<2x8x8x36xbf16>
    %162 = vector.shape_cast %161 : vector<2x8x8x36xbf16> to vector<128x36xbf16>
    %c0_121 = arith.constant 0 : index
    %c0_122 = arith.constant 0 : index
    %163 = vector.load %arg4[%c0_121, %c0_122] : memref<36x4xbf16, #tpu.memory_space<vmem>>, vector<36x4xbf16>
    %cst_123 = arith.constant dense<0.000000e+00> : vector<128x4xf32>
    %164 = tpu.matmul %162, %163, %cst_123 {dimension_numbers = #tpu.dot_dimension_numbers<[1], [0], [0], [1], [0, 0, 1, 1], [], []>} : vector<128x36xbf16>, vector<36x4xbf16>, vector<128x4xf32> -> vector<128x4xf32>
    %165 = vector.extract_strided_slice %164 {offsets = [0, 0], sizes = [64, 4], strides = [1, 1]} : vector<128x4xf32> to vector<64x4xf32>
    %166 = arith.truncf %165 : vector<64x4xf32> to vector<64x4xbf16>
    %c0_124 = arith.constant 0 : index
    %c0_125 = arith.constant 0 : index
    %c0_126 = arith.constant 0 : index
    %c0_127 = arith.constant 0 : index
    %167 = vector.load %arg5[%c0_124, %c0_125, %c0_126, %c0_127] : memref<1x2x64x4xbf16, #tpu.memory_space<vmem>>, vector<1x1x64x4xbf16>
    %168 = vector.shape_cast %167 : vector<1x1x64x4xbf16> to vector<64x4xbf16>
    %169 = vector.shape_cast %166 : vector<64x4xbf16> to vector<1x1x64x4xbf16>
    tpu.vector_store %arg5[%c0_124, %c0_125, %c0_126, %c0_127], %169 {strides = array<i32>} : memref<1x2x64x4xbf16, #tpu.memory_space<vmem>>, vector<1x1x64x4xbf16>,
    %170 = vector.extract_strided_slice %164 {offsets = [64, 0], sizes = [64, 4], strides = [1, 1]} : vector<128x4xf32> to vector<64x4xf32>
    %171 = arith.truncf %170 : vector<64x4xf32> to vector<64x4xbf16>
    %c0_128 = arith.constant 0 : index
    %c1_129 = arith.constant 1 : index
    %c0_130 = arith.constant 0 : index
    %c0_131 = arith.constant 0 : index
    %172 = vector.load %arg5[%c0_128, %c1_129, %c0_130, %c0_131] : memref<1x2x64x4xbf16, #tpu.memory_space<vmem>>, vector<1x1x64x4xbf16>
    %173 = vector.shape_cast %172 : vector<1x1x64x4xbf16> to vector<64x4xbf16>
    %174 = vector.shape_cast %171 : vector<64x4xbf16> to vector<1x1x64x4xbf16>
    tpu.vector_store %arg5[%c0_128, %c1_129, %c0_130, %c0_131], %174 {strides = array<i32>} : memref<1x2x64x4xbf16, #tpu.memory_space<vmem>>, vector<1x1x64x4xbf16>,
    %cst_132 = arith.constant dense<0.000000e+00> : vector<4xf32>
    %175 = vector.multi_reduction <add>, %164, %cst_132 [0] : vector<128x4xf32> to vector<4xf32>
    %176 = vector.shape_cast %175 : vector<4xf32> to vector<1x4xf32>
    %c0_133 = arith.constant 0 : index
    %c0_134 = arith.constant 0 : index
    %c0_135 = arith.constant 0 : index
    %c0_136 = arith.constant 0 : index
    %177 = vector.load %arg6[%c0_133, %c0_134, %c0_135, %c0_136] : memref<1x1x1x4xf32, #tpu.memory_space<vmem>>, vector<1x1x1x4xf32>
    %178 = vector.shape_cast %177 : vector<1x1x1x4xf32> to vector<1x4xf32>
    %179 = vector.shape_cast %176 : vector<1x4xf32> to vector<1x1x1x4xf32>
    tpu.vector_store %arg6[%c0_133, %c0_134, %c0_135, %c0_136], %179 {strides = array<i32>} : memref<1x1x1x4xf32, #tpu.memory_space<vmem>>, vector<1x1x1x4xf32>,
    %180 = arith.mulf %164, %164 : vector<128x4xf32>
    %cst_137 = arith.constant dense<0.000000e+00> : vector<4xf32>
    %181 = vector.multi_reduction <add>, %180, %cst_137 [0] : vector<128x4xf32> to vector<4xf32>
    %182 = vector.shape_cast %181 : vector<4xf32> to vector<1x4xf32>
    %c0_138 = arith.constant 0 : index
    %c0_139 = arith.constant 0 : index
    %c0_140 = arith.constant 0 : index
    %c0_141 = arith.constant 0 : index
    %183 = vector.load %arg7[%c0_138, %c0_139, %c0_140, %c0_141] : memref<1x1x1x4xf32, #tpu.memory_space<vmem>>, vector<1x1x1x4xf32>
    %184 = vector.shape_cast %183 : vector<1x1x1x4xf32> to vector<1x4xf32>
    %185 = vector.shape_cast %182 : vector<1x4xf32> to vector<1x1x1x4xf32>
    tpu.vector_store %arg7[%c0_138, %c0_139, %c0_140, %c0_141], %185 {strides = array<i32>} : memref<1x1x1x4xf32, #tpu.memory_space<vmem>>, vector<1x1x1x4xf32>,
    return
  }
  func.func @transform_0(%arg0: i32, %arg1: i32) -> (i32, i32, i32, i32) {
    %c0_i32 = arith.constant 0 : i32
    %c0_i32_0 = arith.constant 0 : i32
    %c0_i32_1 = arith.constant 0 : i32
    %c0_i32_2 = arith.constant 0 : i32
    return %arg0, %c0_i32, %c0_i32_0, %c0_i32_1 : i32, i32, i32, i32
  }
  func.func @transform_1(%arg0: i32, %arg1: i32) -> (i32, i32, i32, i32) {
    %c0_i32 = arith.constant 0 : i32
    %c0_i32_0 = arith.constant 0 : i32
    %c0_i32_1 = arith.constant 0 : i32
    %c0_i32_2 = arith.constant 0 : i32
    return %arg0, %c0_i32, %c0_i32_0, %c0_i32_1 : i32, i32, i32, i32
  }
  func.func @transform_2(%arg0: i32, %arg1: i32) -> (i32, i32) {
    %c0_i32 = arith.constant 0 : i32
    %c0_i32_0 = arith.constant 0 : i32
    %c0_i32_1 = arith.constant 0 : i32
    return %c0_i32, %c0_i32_0 : i32, i32
  }
  func.func @transform_3(%arg0: i32, %arg1: i32) -> (i32, i32, i32, i32) {
    %c0_i32 = arith.constant 0 : i32
    %c0_i32_0 = arith.constant 0 : i32
    %c0_i32_1 = arith.constant 0 : i32
    return %arg0, %c0_i32, %arg1, %c0_i32_0 : i32, i32, i32, i32
  }
  func.func @transform_4(%arg0: i32, %arg1: i32) -> (i32, i32, i32, i32) {
    %c0_i32 = arith.constant 0 : i32
    %c0_i32_0 = arith.constant 0 : i32
    %c0_i32_1 = arith.constant 0 : i32
    return %arg0, %arg1, %c0_i32, %c0_i32_0 : i32, i32, i32, i32
  }
  func.func @transform_5(%arg0: i32, %arg1: i32) -> (i32, i32, i32, i32) {
    %c0_i32 = arith.constant 0 : i32
    %c0_i32_0 = arith.constant 0 : i32
    %c0_i32_1 = arith.constant 0 : i32
    return %arg0, %arg1, %c0_i32, %c0_i32_0 : i32, i32, i32, i32
  }
}

</mosaic_0001>

<bundles_post_ra>
// kernel: tpu_custom_call.1
= control target key start
LH: loop header
LB: loop body
LE: loop exit
PB: predicated region body
PF: predicated region fallthrough
CT: control target
= control target key end

     0   :  { %s3432_s0 = inlined_call_operand.vmem [shape: f32[2,10,8,4], index: 0, kind: input, shape index: {}]   ;;  %s3433_s1 = inlined_call_operand.vmem [shape: s32[2,10,8,4], index: 1, kind: input, shape index: {}]   ;;  %s3434_s2 = inlined_call_operand.vmem [shape: bf16[36,4], index: 2, kind: input, shape index: {}]   ;;  %s3435_s3 = inlined_call_operand.vmem [shape: bf16[2,2,128,4], index: 3, kind: output, shape index: {0}]   ;;  %s3436_s4 = inlined_call_operand.hbm [shape: f32[2,2,1,4], index: 4, kind: output, shape index: {1}]   ;;  %s3437_s5 = inlined_call_operand.hbm [shape: f32[2,2,1,4], index: 5, kind: output, shape index: {2}]  }
   0x1   :  { %3438 = sst [smem:[#allocation12_spill]] %s3432_s0 }
   0x2   :  { %11 = vsyncpa [#allocation7], 0 }
   0x3   :  { %13 = vsyncpa [#allocation7 + $0x1], 0 }
   0x4   :  { %14 = vsyncpa [#allocation9], 0 }
   0x5   :  { %16 = vsyncpa [#allocation9 + $0x1], 0  ;;  %s2444_s18 = smov 0   ;;  %s2446_s19 = smov 0  }
   0x6   :  { %s2448_s20 = smov 0   ;;  %s2450_s21 = smov 0  }
   0x7   :  { %s2452_s22 = smov 0   ;;  %s2454_s23 = smov 0  }
   0x8   :  { %s2456_s24 = smov 0   ;;  %s2458_s25 = smov 0  }
   0x9 LB: > { %s2046_s26 = sadd.s32 4294967295, %s2401_s25   ;;  %s2047_s27 = sadd.s32 4294967294, %s2401_s25   ;;  %s2401_s25 = sphi %s2458_s25, %s22_s25   ;;  %s2397_s24 = sphi %s2456_s24, %s3454_s24   ;;  %s2393_s23 = sphi %s2454_s23, %s3453_s23   ;;  %s2389_s22 = sphi %s2452_s22, %s3452_s22   ;;  %s2385_s21 = sphi %s2450_s21, %s3451_s21   ;;  %s2381_s20 = sphi %s2448_s20, %s3450_s20   ;;  %s2377_s19 = sphi %s2446_s19, %s3449_s19   ;;  %s2373_s18 = sphi %s2444_s18, %s3448_s18  }
   0xa   : > { %s31_s28 = sadd.s32 1, %s2393_s23  ;;  %s34_s29 = sadd.s32 1, %s2397_s24 }
   0xb   : > { %p32_p0 = scmp.ge.s32.totalorder %s31_s28, 2  ;;  %p126_p1 = scmp.ne.s32.totalorder %s2381_s20, %s2377_s19 }
   0xc   : > { %p127_p2 = scmp.eq.s32.totalorder %s2046_s26, 3  ;;  %p160_p5 = scmp.ne.s32.totalorder %s2377_s19, %s2373_s18 }
   0xd   : > { %s3456_s28 = smov (%p32_p0, %s31_s28), 0  ;;  %s3458_s29 = smov (!%p32_p0, %s34_s29), %s2397_s24 }
   0xe   : > { %s112_s30 = ssub.s32 %s2393_s23, %s3456_s28  ;;  %p2495_p3 = por %p127_p2, %p126_p1 }
   0xf   : > { %p36_p4 = scmp.ge.s32.totalorder %s3458_s29, 2  ;;  %p161_p6 = scmp.eq.s32.totalorder %s2047_s27, 3 }
  0x10   : > { %p2050_p7 = scmp.ge.s32.totalorder %s2401_s25, 1  ;;  %p226_p9 = scmp.lt.s32.totalorder %s2401_s25, 5 }
  0x11   : > { %s3460_s29 = smov (%p36_p4, %s3458_s29), 0  ;;  %p2504_p8 = por %p161_p6, %p160_p5 }
  0x12   : > { %s111_s8 = ssub.s32 %s2397_s24, %s3460_s29  ;;  %s116_s9 = sadd.s32 1, %s2381_s20 }
  0x13   : > { %s113_s10 = sor.u32 %s112_s30, %s111_s8  ;;  %p227_p10 = pnand %p2050_p7, %p226_p9 }
  0x14   : > { %p114_p11 = scmp.eq.s32.totalorder %s113_s10, 0  ;;  %p266_p12 = scmp.lt.s32.totalorder (!%p227_p10), %s2389_s22, 1  ;;  %v301_v0 = vlaneseq (!%p227_p10)  ;;  %vm376_vm0 = vcmask (!%p227_p10), 27648   ;;  %v2403_v1 = vmov (!%p227_p10), 0   ;;  %vm538_vm9 = vsmask.f32 (!%p227_p10), 256 }
  0x15   : > { %230 = sbr.rel (%p227_p10) target bundleno = 710 (0x2c6), region = 32  ;;  %s2054_s12 = sshll.u32 (!%p227_p10), %s2385_s21, 2  ;;  %476 = vst.msk [vmem:[#allocation3 + $0x18] sm:$0xf] (!%p227_p10), %vm376_vm0, %v2403_v1  ;;  %402 = vst.msk [vmem:[#allocation2 + $0x14] sm:$0xf] (!%p227_p10), %vm376_vm0, %v2403_v1 }
  0x16   : > { %s2513_s11 = scalar_select %p114_p11, %s2381_s20, %s116_s9  }
  0x17   : > { %s2056_s13 = sadd.s32 (!%p227_p10), 4294967295, %s2054_s12  ;;  %403 = vst.msk [vmem:[#allocation2 + $0x20] sm:$0xf] (!%p227_p10), %vm376_vm0, %v2403_v1  ;;  %404 = vst.msk [vmem:[#allocation2 + $0x2c] sm:$0xf] (!%p227_p10), %vm376_vm0, %v2403_v1  ;;  %v302_v3 = vshrl.u32 (!%p227_p10), %v301_v0, 7 }
  0x18   : > { %405 = vst.msk [vmem:[#allocation2 + $0x38] sm:$0xf] (!%p227_p10), %vm376_vm0, %v2403_v1  ;;  %406 = vst.msk [vmem:[#allocation2 + $0x44] sm:$0xf] (!%p227_p10), %vm376_vm0, %v2403_v1  ;;  %v2540_v2 = vstv (!%p227_p10), %s2056_s13  ;;  %s2120_s16 = sshll.u32 (!%p227_p10), %s2385_s21, 5  ;;  %s3441_s0 = sld [smem:[#allocation12_spill]] (!%p227_p10) }
  0x19   : > { %407 = vst.msk [vmem:[#allocation2 + $0x50] sm:$0xf] (!%p227_p10), %vm376_vm0, %v2403_v1  ;;  %408 = vst.msk [vmem:[#allocation2 + $0x5c] sm:$0xf] (!%p227_p10), %vm376_vm0, %v2403_v1  ;;  %v297_v4 = vadd.s32 (!%p227_p10), 2, %v2540_v2  ;;  %v303_v5 = vmul.u32 (!%p227_p10), 2, %v2540_v2 }
  0x1a   : > { %409 = vst.msk [vmem:[#allocation2 + $0x68] sm:$0xf] (!%p227_p10), %vm376_vm0, %v2403_v1  ;;  %410 = vst.msk [vmem:[#allocation2 + $0x74] sm:$0xf] (!%p227_p10), %vm376_vm0, %v2403_v1  ;;  %v296_v6 = vadd.s32 (!%p227_p10), 1, %v2540_v2  ;;  %v2546_v7 = vmul.u32 (!%p227_p10), 2, %v302_v3 }
  0x1b   : > { %411 = vst.msk [vmem:[#allocation2 + $0x80] sm:$0xf] (!%p227_p10), %vm376_vm0, %v2403_v1  ;;  %475 = vst.msk [vmem:[#allocation3 + $0xc] sm:$0xf] (!%p227_p10), %vm376_vm0, %v2403_v1  ;;  %v305_v8 = vmul.u32 (!%p227_p10), 2, %v297_v4  ;;  %v334_v9 = vadd.s32 (!%p227_p10), 1, %v303_v5 }
  0x1c   : > { %477 = vst.msk [vmem:[#allocation3 + $0x24] sm:$0xf] %vm376_vm0, %v2403_v1  ;;  %478 = vst.msk [vmem:[#allocation3 + $0x30] sm:$0xf] %vm376_vm0, %v2403_v1  ;;  %s267_s14 = scalar_select %p266_p12, %s2389_s22, 1  ;;  %v2555_v10 = vadd.s32 1, %v2546_v7 }
  0x1d   : > { %479 = vst.msk [vmem:[#allocation3 + $0x3c] sm:$0xf] %vm376_vm0, %v2403_v1  ;;  %480 = vst.msk [vmem:[#allocation3 + $0x48] sm:$0xf] %vm376_vm0, %v2403_v1  ;;  %v304_v11 = vmul.u32 2, %v296_v6  ;;  %v311_v12 = vmul.u32 16, %v305_v8 }
  0x1e   : > { %481 = vst.msk [vmem:[#allocation3 + $0x54] sm:$0xf] %vm376_vm0, %v2403_v1  ;;  %482 = vst.msk [vmem:[#allocation3 + $0x60] sm:$0xf] %vm376_vm0, %v2403_v1  ;;  %s2178_s15 = smul.u32 80, %s267_s14  ;;  %v340_v13 = vmul.u32 16, %v334_v9 }
  0x1f   : > { %483 = vst.msk [vmem:[#allocation3 + $0x6c] sm:$0xf] %vm376_vm0, %v2403_v1  ;;  %484 = vst.msk [vmem:[#allocation3 + $0x78] sm:$0xf] %vm376_vm0, %v2403_v1  ;;  %v2562_v14 = vadd.s32 3, %v2540_v2  ;;  %v310_v16 = vmul.u32 16, %v304_v11  ;;  %v318_v20 = vadd.s32 %v2546_v7, %v311_v12  ;;  %v416_v24 = vadd.s32 %v2555_v10, %v311_v12 }
  0x20   : > { %s270_s27 = scalar_lea.vmem %s3441_s0, %s2178_s15  ;;  %s275_s9 = scalar_lea.vmem %s3433_s1, %s2178_s15  ;;  %v335_v17 = vadd.s32 1, %v304_v11  ;;  %v336_v18 = vadd.s32 1, %v305_v8  ;;  %v346_v23 = vadd.s32 %v340_v13, %v2546_v7  ;;  %v432_v25 = vadd.s32 %v2555_v10, %v340_v13  ;;  %v500_v47 = vld [vmem:[#allocation3 + $0x18] sm:$0x8] }
  0x21   : > { %s2557_s10 = scalar_lea.vmem %s270_s27, %s2120_s16  ;;  %s2559_s12 = scalar_lea.vmem %s275_s9, %s2120_s16  ;;  %v415_v28 = vadd.s32 %v2555_v10, %v310_v16  ;;  %v317_v34 = vadd.s32 %v2546_v7, %v310_v16  ;;  %v555_v53 = vshrl.u32 %v500_v47, 16  ;;  %v306_v55 = vmul.u32 2, %v2562_v14 }
  0x22   : > { %v2565_v15 = vld [vmem:[%s2559_s12 + $0x10] sm:$0xff]  ;;  %v281_v21 = vld [vmem:[%s2557_s10] sm:$0xff]  ;;  %v289_v26 = vld [vmem:[%s2559_s12 + $0x8] sm:$0xff]  ;;  %v341_v27 = vmul.u32 16, %v335_v17  ;;  %v342_v45 = vmul.u32 16, %v336_v18  ;;  %v2593_v56 = vadd.s32 4, %v2540_v2 }
  0x23   : > { %v283_v19 = vld [vmem:[%s2557_s10 + $0x10] sm:$0xff]  ;;  %v288_v22 = vld [vmem:[%s2559_s12] sm:$0xff]  ;;  %vm324_vm1 = vcmp.eq.s32.totalorder %v2565_v15, %v318_v20  ;;  %v282_v29 = vld [vmem:[%s2557_s10 + $0x8] sm:$0xff]  ;;  %vm421_vm3 = vcmp.eq.s32.totalorder %v289_v26, %v415_v28  ;;  %vm422_vm4 = vcmp.eq.s32.totalorder %v2565_v15, %v416_v24  ;;  %vm323_vm6 = vcmp.eq.s32.totalorder %v289_v26, %v317_v34  ;;  %s2404_s13 = smov 4   ;;  %s2405_s14 = smov 8  }
  0x24   : > { %vm352_vm2 = vcmp.eq.s32.totalorder %v288_v22, %v346_v23  ;;  %v330_v30 = vsel %vm324_vm1, %v283_v19, 0.0  ;;  %v427_v35 = vsel %vm421_vm3, %v282_v29, 0.0  ;;  %vm438_vm5 = vcmp.eq.s32.totalorder %v288_v22, %v432_v25  ;;  %v502_v49 = vld [vmem:[#allocation3 + $0x24] sm:$0x8]  ;;  %v504_v54 = vld [vmem:[#allocation3 + $0x30] sm:$0x8] }
  0x25   : > { %v358_v31 = vsel %vm352_vm2, %v281_v21, 0.0  ;;  %v368_v32 = vpack.c.bf16 %v330_v30, %v330_v30  ;;  %v347_v36 = vadd.s32 %v341_v27, %v2546_v7  ;;  %v452_v37 = vpack.c.bf16 %v427_v35, %v427_v35  ;;  %v506_v59 = vld [vmem:[#allocation3 + $0x3c] sm:$0x8]  ;;  %v2621_v13 = vld [vmem:[%s2559_s12 + $0x18] sm:$0xff]  ;;  %s2406_s15 = smov 16   ;;  %s2407_s16 = smov 20  }
  0x26   : > { %v365_v33 = vpack.c.bf16 %v358_v31, %v358_v31  ;;  %v428_v38 = vsel %vm422_vm4, %v283_v19, 0.0  ;;  %v444_v39 = vsel %vm438_vm5, %v281_v21, 0.0  ;;  %v329_v40 = vsel %vm323_vm6, %v282_v29, 0.0  ;;  %v2623_v14 = vld [vmem:[#allocation3 + $0x48] sm:$0x8]  ;;  %s2408_s17 = smov 12  }
  0x27   : > { %381 = vst.msk [vmem:[#allocation2 + $0x34] sm:$0xf] %vm376_vm0, %v368_v32  ;;  %v454_v41 = vpack.c.bf16 %v428_v38, %v428_v38  ;;  %v451_v42 = vpack.c.bf16 %v444_v39, %v444_v39  ;;  %vm353_vm7 = vcmp.eq.s32.totalorder %v289_v26, %v347_v36  ;;  %464 = vst.msk [vmem:[#allocation3 + $0x1c] sm:$0xf] %vm376_vm0, %v452_v37  ;;  %v568_v58 = vshrl.u32 %v502_v49, 16  ;;  %v2644_v23 = vld [vmem:[%s2557_s10 + $0x18] sm:$0xff] }
  0x28   : > { %378 = vst.msk [vmem:[#allocation2 + $0x10] sm:$0xf] %vm376_vm0, %v365_v33  ;;  %v366_v43 = vpack.c.bf16 %v329_v40, %v329_v40  ;;  %v359_v44 = vsel %vm353_vm7, %v282_v29, 0.0  ;;  %v433_v46 = vadd.s32 %v2555_v10, %v341_v27  ;;  %v348_v50 = vadd.s32 %v342_v45, %v2546_v7  ;;  %v2665_v33 = vld [vmem:[%s2559_s12 + $0x20] sm:$0xff]  ;;  %s2409_s26 = smov 24   ;;  %s2410_s8 = smov 28  }
  0x29   : > { %466 = vst.msk [vmem:[#allocation3 + $0x34] sm:$0xf] %vm376_vm0, %v454_v41  ;;  %463 = vst.msk [vmem:[#allocation3 + $0x10] sm:$0xf] %vm376_vm0, %v451_v42  ;;  %v367_v48 = vpack.c.bf16 %v359_v44, %v359_v44  ;;  %v434_v51 = vadd.s32 %v2555_v10, %v342_v45  ;;  %vm539_vm12 = vsmask.f32 4368 }
  0x2a   : > { %379 = vst.msk [vmem:[#allocation2 + $0x1c] sm:$0xf] %vm376_vm0, %v366_v43  ;;  %vm439_vm8 = vcmp.eq.s32.totalorder %v289_v26, %v433_v46  ;;  %vm354_vm10 = vcmp.eq.s32.totalorder %v2565_v15, %v348_v50  ;;  %v581_v1 = vshrl.u32 %v504_v54, 16  ;;  %v594_v5 = vshrl.u32 %v506_v59, 16  ;;  %vm2658_vm13 = vmor %vm538_vm9, %vm539_vm12  ;;  %v2680_v43 = vld [vmem:[%s2557_s10 + $0x20] sm:$0xff]  ;;  %s2411_s30 = smov 32  }
  0x2b   : > { %380 = vst.msk [vmem:[#allocation2 + $0x28] sm:$0xf] %vm376_vm0, %v367_v48  ;;  %v445_v52 = vsel %vm439_vm8, %v282_v29, 0.0  ;;  %vm440_vm11 = vcmp.eq.s32.totalorder %v2565_v15, %v434_v51  ;;  %v360_v62 = vsel %vm354_vm10, %v283_v19, 0.0  ;;  %v312_v6 = vmul.u32 16, %v306_v55  ;;  %s2111_s9 = sshll.u32 (%p2495_p3), %s2385_s21, 3 }
  0x2c   : > { %v453_v57 = vpack.c.bf16 %v445_v52, %v445_v52  ;;  %v446_v63 = vsel %vm440_vm11, %v283_v19, 0.0  ;;  %v369_v0 = vpack.c.bf16 %v360_v62, %v360_v62  ;;  %v307_v8 = vmul.u32 2, %v2593_v56 }
  0x2d   : > { %v455_v3 = vpack.c.bf16 %v446_v63, %v446_v63  ;;  %v2614_v9 = vadd.s32 5, %v2540_v2  ;;  %v2058_v11 = vrot.slane %v555_v53, 11  ;;  %v2617_v12 = vrot.slane %v568_v58, 11 }
  0x2e   : > { %v2597_v60 = vld [vmem:[#allocation2 + $0x34] sm:$0xf]  ;;  %465 = vst.msk [vmem:[#allocation3 + $0x28] sm:$0xf] %vm376_vm0, %v453_v57  ;;  %v2610_v4 = vld [vmem:[#allocation3 + $0x1c] sm:$0xf]  ;;  %v417_v24 = vadd.s32 %v2555_v10, %v312_v6  ;;  %v319_v28 = vadd.s32 %v2546_v7, %v312_v6 }
  0x2f   : > { %v2599_v61 = vld [vmem:[#allocation2 + $0x10] sm:$0xf]  ;;  %675 = vrot.lane.b32.xlu1 %v2597_v60, %s2404_s13  ;;  %975 = vst.msk [vmem:[#allocation4 + $0x2c] sm:$0xf] %vm376_vm0, %v2597_v60  ;;  %382 = vst.msk [vmem:[#allocation2 + $0x40] sm:$0xf] %vm376_vm0, %v369_v0 }
  0x30   : > { %669 = vrot.lane.b32.xlu0 %v2599_v61, %s2404_s13  ;;  %972 = vst.msk [vmem:[#allocation4 + $0x20] sm:$0xf] %vm376_vm0, %v2599_v61  ;;  %467 = vst.msk [vmem:[#allocation3 + $0x40] sm:$0xf] %vm376_vm0, %v455_v3  ;;  %v2625_v15 = vadd.s32 1, %v306_v55  ;;  %v560_v2 = vshrl.u32 %v2610_v4, 16  ;;  %vm423_vm14 = vcmp.eq.s32.totalorder %v2621_v13, %v417_v24  ;;  %vm325_vm15 = vcmp.eq.s32.totalorder %v2621_v13, %v319_v28 }
  0x31   : > { %v2627_v16 = vld [vmem:[#allocation2 + $0x1c] sm:$0xf]  ;;  %v2629_v17 = vld [vmem:[#allocation3 + $0x34] sm:$0xf]  ;;  %v563_v18 = vshll.u32 %v2610_v4, 16  ;;  %v2060_v20 = vrot.slane %v581_v1, 11 }
  0x32   : > { %973 = vst.msk [vmem:[#allocation4 + $0x24] sm:$0xf] %vm376_vm0, %v2627_v16  ;;  %v2639_v19 = vld [vmem:[#allocation2 + $0x28] sm:$0xf]  ;;  %v586_v21 = vshrl.u32 %v2629_v17, 16  ;;  %v589_v22 = vshll.u32 %v2629_v17, 16 }
  0x33   : > { %712 = vrot.lane.b32.xlu1 %v2610_v4, %s2405_s14  ;;  %v2647_v25 = vld [vmem:[#allocation3 + $0x10] sm:$0xf]  ;;  %974 = vst.msk [vmem:[#allocation4 + $0x28] sm:$0xf] %vm376_vm0, %v2639_v19  ;;  %v562_v26 = vrot.slane %v560_v2, 7  ;;  %v2651_v27 = vrot.slane %v594_v5, 11 }
  0x34   : > { %671 = vrot.lane.b32.xlu0 %v2627_v16, %s2404_s13  ;;  %v313_v29 = vmul.u32 16, %v307_v8  ;;  %v588_v31 = vrot.slane %v586_v21, 7  ;;  %v607_v32 = vshrl.u32 %v2623_v14, 16  ;;  %v343_v34 = vmul.u32 16, %v2625_v15  ;;  %v2731_v2 = vld [vmem:[#allocation3 + $0x54] sm:$0x8] }
  0x35   : > { %v2668_v35 = vld [vmem:[#allocation3 + $0x28] sm:$0xf]  ;;  %v565_v36 = vor.u32 %v563_v18, %v562_v26  ;;  %v429_v37 = vsel %vm423_vm14, %v2644_v23, 0.0  ;;  %v331_v47 = vsel %vm325_vm15, %v2644_v23, 0.0  ;;  %v547_v63 = vshrl.u32 %v2647_v25, 16 }
  0x36   : > { %v320_v38 = vadd.s32 %v2546_v7, %v313_v29  ;;  %v573_v39 = vshrl.u32 %v2668_v35, 16  ;;  %v576_v40 = vshll.u32 %v2668_v35, 16  ;;  %v591_v41 = vor.u32 %v589_v22, %v588_v31  ;;  %v2682_v44 = vld [vmem:[#allocation2 + $0x40] sm:$0xf] }
  0x37   : > { %716 = vrot.lane.b32.xlu1 %v2629_v17, %s2405_s14  ;;  %v456_v42 = vpack.c.bf16 %v429_v37, %v429_v37  ;;  %v2686_v45 = vsel %vm2658_vm13, %v2058_v11, %v565_v36  ;;  %v2688_v46 = vld [vmem:[#allocation3 + $0x40] sm:$0xf]  ;;  %v349_v48 = vadd.s32 %v343_v34, %v2546_v7  ;;  %976 = vst.msk [vmem:[#allocation4 + $0x30] sm:$0xf] %vm376_vm0, %v2682_v44  ;;  %v338_v11 = vadd.s32 1, %v307_v8  ;;  %v293_v37 = vld [vmem:[%s2559_s12 + $0x28] sm:$0xff] }
  0x38   : > { %710 = vrot.lane.b32.xlu0 %v2647_v25, %s2405_s14  ;;  %vm326_vm1 = vcmp.eq.s32.totalorder %v2665_v33, %v320_v38  ;;  %654 = vst.msk [vmem:[#allocation4 + $0x4] sm:$0xf] %vm376_vm0, %v2686_v45  ;;  %v575_v49 = vrot.slane %v573_v39, 7  ;;  %v2699_v50 = vsel %vm2658_vm13, %v2060_v20, %v591_v41  ;;  %v599_v51 = vshrl.u32 %v2688_v46, 16 }
  0x39   : > { %v602_v52 = vshll.u32 %v2688_v46, 16  ;;  %468 = vst.msk [vmem:[#allocation3 + $0x4c] sm:$0xf] %vm376_vm0, %v456_v42  ;;  %656 = vst.msk [vmem:[#allocation4 + $0xc] sm:$0xf] %vm376_vm0, %v2699_v50  ;;  %v370_v53 = vpack.c.bf16 %v331_v47, %v331_v47  ;;  %v332_v54 = vsel %vm326_vm1, %v2680_v43, 0.0  ;;  %vm355_vm2 = vcmp.eq.s32.totalorder %v2621_v13, %v349_v48 }
  0x3a   : > { %v418_v55 = vadd.s32 %v2555_v10, %v313_v29  ;;  %v578_v57 = vor.u32 %v576_v40, %v575_v49  ;;  %v601_v58 = vrot.slane %v599_v51, 7  ;;  %v372_v59 = vpack.c.bf16 %v332_v54, %v332_v54  ;;  %v286_v42 = vld [vmem:[%s2557_s10 + $0x28] sm:$0xff]  ;;  %s2112_s10 = sshll.u32 (%p2495_p3), %s2389_s22, 5 }
  0x3b   : > { %673 = vrot.lane.b32.xlu1 %v2639_v19, %s2404_s13  ;;  %v361_v62 = vsel %vm355_vm2, %v2644_v23, 0.0  ;;  %383 = vst.msk [vmem:[#allocation2 + $0x4c] sm:$0xf] %vm376_vm0, %v370_v53  ;;  %v435_v1 = vadd.s32 %v2555_v10, %v343_v34  ;;  %v344_v18 = vmul.u32 16, %v338_v11  ;;  %v308_v20 = vmul.u32 2, %v2614_v9  ;;  %s1773_s12 = sadd.s32 (%p2495_p3), %s2112_s10, %s2111_s9 }
  0x3c   : > { %790 = vrot.lane.b32.xlu0 %v2627_v16, %s2406_s15  ;;  %v371_v0 = vpack.c.bf16 %v361_v62, %v361_v62  ;;  %vm424_vm3 = vcmp.eq.s32.totalorder %v2665_v33, %v418_v55  ;;  %v2721_v3 = vsel %vm2658_vm13, %v2617_v12, %v578_v57  ;;  %v604_v5 = vor.u32 %v602_v52, %v601_v58  ;;  %v512_v12 = vld [vmem:[#allocation3 + $0x60] sm:$0x8]  ;;  %s2113_s27 = sshll.u32 (%p2495_p3), %s1773_s12, 2 }
  0x3d   : > { %385 = vst.msk [vmem:[#allocation2 + $0x64] sm:$0xf] %vm376_vm0, %v372_v59  ;;  %v430_v6 = vsel %vm424_vm3, %v2680_v43, 0.0  ;;  %655 = vst.msk [vmem:[#allocation4 + $0x8] sm:$0xf] %vm376_vm0, %v2721_v3  ;;  %vm441_vm4 = vcmp.eq.s32.totalorder %v2621_v13, %v435_v1  ;;  %v549_v21 = vrot.slane %v547_v63, 7  ;;  %v436_v28 = vadd.s32 %v2555_v10, %v344_v18 }
  0x3e   : > { %384 = vst.msk [vmem:[#allocation2 + $0x58] sm:$0xf] %vm376_vm0, %v371_v0  ;;  %v458_v15 = vpack.c.bf16 %v430_v6, %v430_v6  ;;  %v2740_v56 = vsel %vm2658_vm13, %v2651_v27, %v604_v5  ;;  %v447_v8 = vsel %vm441_vm4, %v2644_v23, 0.0  ;;  %v498_v13 = vld [vmem:[#allocation3 + $0xc] sm:$0x8]  ;;  %v550_v22 = vshll.u32 %v2647_v25, 16 }
  0x3f   : > { %792 = vrot.lane.b32.xlu1 %v2639_v19, %s2406_s15  ;;  %657 = vst.msk [vmem:[#allocation4 + $0x10] sm:$0xf] %vm376_vm0, %v2740_v56  ;;  %v2062_v26 = vrot.slane %v607_v32, 11  ;;  %v457_v27 = vpack.c.bf16 %v447_v8, %v447_v8  ;;  %v350_v29 = vadd.s32 %v344_v18, %v2546_v7  ;;  %v620_v31 = vshrl.u32 %v2731_v2, 16 }
  0x40   : > { %794 = vrot.lane.b32.xlu0 %v2597_v60, %s2406_s15  ;;  %v2747_v24 = vld [vmem:[#allocation3 + $0x4c] sm:$0xf]  ;;  %470 = vst.msk [vmem:[#allocation3 + $0x64] sm:$0xf] %vm376_vm0, %v458_v15  ;;  %v633_v34 = vshrl.u32 %v512_v12, 16  ;;  %v314_v14 = vmul.u32 16, %v308_v20  ;;  %vm442_vm5 = vcmp.eq.s32.totalorder %v2665_v33, %v436_v28  ;;  %v552_v53 = vor.u32 %v550_v22, %v549_v21 }
  0x41   : > { %v612_v23 = vshrl.u32 %v2747_v24, 16  ;;  %v615_v9 = vshll.u32 %v2747_v24, 16  ;;  %469 = vst.msk [vmem:[#allocation3 + $0x58] sm:$0xf] %vm376_vm0, %v457_v27  ;;  %vm356_vm6 = vcmp.eq.s32.totalorder %v2665_v33, %v350_v29  ;;  %v542_v38 = vshrl.u32 %v498_v13, 16  ;;  %v2264_v20 = vld [vmem:[%s3434_s2] sm:$0xff]  }
  0x42   : > { %v2762_v36 = vld [vmem:[#allocation2 + $0x4c] sm:$0xf]  ;;  %v448_v40 = vsel %vm442_vm5, %v2680_v43, 0.0  ;;  %v362_v41 = vsel %vm356_vm6, %v2680_v43, 0.0  ;;  %v419_v47 = vadd.s32 %v2555_v10, %v314_v14  ;;  %v2064_v54 = vrot.slane %v633_v34, 11  ;;  %2148 = vmatprep.subr.bf16.mxu0 %v2264_v20  ;;  %2170 = vmatprep.subr.bf16.mxu1 %v2264_v20 }
  0x43   : > { %796 = vrot.lane.b32.xlu1 %v2682_v44, %s2406_s15  ;;  %v614_v32 = vrot.slane %v612_v23, 7  ;;  %977 = vst.msk [vmem:[#allocation4 + $0x34] sm:$0xf] %vm376_vm0, %v2762_v36  ;;  %v459_v33 = vpack.c.bf16 %v448_v40, %v448_v40  ;;  %v373_v51 = vpack.c.bf16 %v362_v41, %v362_v41  ;;  %v2057_v52 = vrot.slane %v542_v38, 11  ;;  %2149 = vmatpush3.bf16.msra.mxu0 %v2264_v20  ;;  %v514_v22 = vld [vmem:[#allocation3 + $0x6c] sm:$0x8] }
  0x44   : > { %714 = vrot.lane.b32.xlu0 %v2668_v35, %s2405_s14  ;;  %v2769_v39 = vld [vmem:[#allocation2 + $0x64] sm:$0xf]  ;;  %vm425_vm7 = vcmp.eq.s32.totalorder %v293_v37, %v419_v47  ;;  %v321_v57 = vadd.s32 %v2546_v7, %v314_v14  ;;  %v2063_v7 = vrot.slane %v620_v31, 11  ;;  %2173 = vmatpush3.bf16.msra.mxu1 %v2264_v20  ;;  %vm1480_vm9 = vcmask 1041408  }
  0x45   : > { %v617_v48 = vor.u32 %v615_v9, %v614_v32  ;;  %979 = vst.msk [vmem:[#allocation4 + $0x3c] sm:$0xf] %vm376_vm0, %v2769_v39  ;;  %v2777_v49 = vld [vmem:[#allocation2 + $0x58] sm:$0xf]  ;;  %471 = vst.msk [vmem:[#allocation3 + $0x70] sm:$0xf] %vm376_vm0, %v459_v33  ;;  %v553_v63 = vsel %vm2658_vm13, %v2057_v52, %v552_v53 }
  0x46   : > { %978 = vst.msk [vmem:[#allocation4 + $0x38] sm:$0xf] %vm376_vm0, %v2777_v49  ;;  %386 = vst.msk [vmem:[#allocation2 + $0x70] sm:$0xf] %vm376_vm0, %v373_v51  ;;  %v431_v55 = vsel %vm425_vm7, %v286_v42, 0.0  ;;  %vm327_vm8 = vcmp.eq.s32.totalorder %v293_v37, %v321_v57  ;;  %vm693_vm10 = vcmask 60448  }
  0x47   : > { %826 = vrot.lane.b32.xlu1 %v2668_v35, %s2407_s16  ;;  %v2787_v10 = vsel %vm2658_vm13, %v2062_v26, %v617_v48  ;;  %v2789_v43 = vld [vmem:[#allocation3 + $0x64] sm:$0xf]  ;;  %v460_v62 = vpack.c.bf16 %v431_v55, %v431_v55  ;;  %653 = vst.msk [vmem:[#allocation4] sm:$0xf] %vm376_vm0, %v553_v63  ;;  %v333_v15 = vsel %vm327_vm8, %v286_v42, 0.0  ;;  %v744_v26 = vshrl.u32 %v514_v22, 16 }
  0x48   : > { %756 = vrot.lane.b32.xlu0 %v2686_v45, %s2408_s17  ;;  %658 = vst.msk [vmem:[#allocation4 + $0x14] sm:$0xf] %vm376_vm0, %v2787_v10  ;;  %v638_v58 = vshrl.u32 %v2789_v43, 16  ;;  %v641_v45 = vshll.u32 %v2789_v43, 16  ;;  %v2798_v59 = vld [vmem:[#allocation3 + $0x58] sm:$0xf]  ;;  %v374_v2 = vpack.c.bf16 %v333_v15, %v333_v15 }
  0x49   : > { %v625_v0 = vshrl.u32 %v2798_v59, 16  ;;  %v628_v1 = vshll.u32 %v2798_v59, 16  ;;  %472 = vst.msk [vmem:[#allocation3 + $0x7c] sm:$0xf] %vm376_vm0, %v460_v62  ;;  %v2065_v9 = vrot.slane %v744_v26, 11  ;;  %v1016_v30 = vshrl.u32 %v2599_v61, 16 }
  0x4a   : > { %v640_v5 = vrot.slane %v638_v58, 7  ;;  %387 = vst.msk [vmem:[#allocation2 + $0x7c] sm:$0xf] %vm376_vm0, %v374_v2  ;;  %v516_v32 = vld [vmem:[#allocation3 + $0x78] sm:$0x8]  ;;  %v1019_v52 = vshll.u32 %v2599_v61, 16 }
  0x4b   : > { %758 = vrot.lane.b32.xlu1 %v2721_v3, %s2408_s17  ;;  %v627_v6 = vrot.slane %v625_v0, 7  ;;  %v858_v37 = vshrl.u32 %v516_v32, 16  ;;  %v1030_v53 = vshrl.u32 %v2627_v16, 16  ;;  %vm734_vm11 = vcmask 93248   ;;  %v529_v61 = vld [vmem:[#allocation2 + $0x20] sm:$0x1] }
  0x4c   : > { %760 = vrot.lane.b32.xlu0 %v2699_v50, %s2408_s17  ;;  %v643_v11 = vor.u32 %v641_v45, %v640_v5  ;;  %v2868_v13 = vld [vmem:[#allocation3 + $0x70] sm:$0xf]  ;;  %v1018_v57 = vrot.slane %v1016_v30, 4  ;;  %v1021_v58 = vrot.slane %v1019_v52, 5  ;;  %v528_v63 = vld [vmem:[#allocation2 + $0x14] sm:$0x1] }
  0x4d   : > { %v630_v12 = vor.u32 %v628_v1, %v627_v6  ;;  %v749_v21 = vshrl.u32 %v2868_v13, 16  ;;  %v752_v23 = vshll.u32 %v2868_v13, 16  ;;  %v2897_v31 = vld [vmem:[#allocation2 + $0x70] sm:$0xf]  ;;  %v2066_v41 = vrot.slane %v858_v37, 11 }
  0x4e   : > { %v2812_v8 = vsel %vm2658_vm13, %v2064_v54, %v643_v11  ;;  %v1032_v45 = vrot.slane %v1030_v53, 4  ;;  %v1058_v0 = vshrl.u32 %v2597_v60, 16  ;;  %v1061_v1 = vshll.u32 %v2597_v60, 16  ;;  %v530_v26 = vld [vmem:[#allocation2 + $0x2c] sm:$0x1] }
  0x4f   : > { %762 = vrot.lane.b32.xlu1 %v2740_v56, %s2408_s17  ;;  %660 = vst.msk [vmem:[#allocation4 + $0x1c] sm:$0xf] %vm376_vm0, %v2812_v8  ;;  %v2823_v18 = vsel %vm2658_vm13, %v2063_v7, %v630_v12  ;;  %v751_v27 = vrot.slane %v749_v21, 7  ;;  %v1044_v5 = vshrl.u32 %v2639_v19, 16  ;;  %v1047_v7 = vshll.u32 %v2639_v19, 16 }
  0x50   : > { %824 = vrot.lane.b32.xlu0 %v2610_v4, %s2407_s16  ;;  %659 = vst.msk [vmem:[#allocation4 + $0x18] sm:$0xf] %vm376_vm0, %v2823_v18  ;;  %v2899_v34 = vld [vmem:[#allocation3 + $0x7c] sm:$0xf]  ;;  %v1039_v2 = vshll.u32 %v529_v61, 16  ;;  %v1022_v12 = vor.u32 %v1021_v58, %v1018_v57  ;;  %v1060_v20 = vrot.slane %v1058_v0, 4 }
  0x51   : > { %v754_v28 = vor.u32 %v752_v23, %v751_v27  ;;  %v863_v14 = vshrl.u32 %v2899_v34, 16  ;;  %v866_v40 = vshll.u32 %v2899_v34, 16  ;;  %v2927_v48 = vld [vmem:[#allocation2 + $0x7c] sm:$0xf]  ;;  %vm1012_vm12 = vsmask.f32 3328 }
  0x52   : > { %v1041_v27 = vrot.slane %v1039_v2, 5  ;;  %v1023_v23 = vrot.slane %v1022_v12, 4  ;;  %vm780_vm15 = vcmask 126048   ;;  %vm814_vm1 = vcmask 158848  }
  0x53   : > { %830 = vrot.lane.b32.xlu1 %v2688_v46, %s2407_s16  ;;  %v755_v29 = vsel %vm2658_vm13, %v2065_v9, %v754_v28  ;;  %v865_v38 = vrot.slane %v863_v14, 7  ;;  %vm848_vm2 = vcmask 191648   ;;  %vm894_vm3 = vcmask 224448  }
  0x54   : > { %828 = vrot.lane.b32.xlu0 %v2629_v17, %s2407_s16  ;;  %vm928_vm4 = vcmask 257248   ;;  %vm962_vm5 = vcmask 290048   ;;  %vm1455_vm6 = vcmask 293888   ;;  %vm1662_vm7 = vcmask 31744  }
  0x55   : > { %v868_v42 = vor.u32 %v866_v40, %v865_v38  ;;  %v1053_v38 = vshll.u32 %v530_v26, 16 }
  0x57   : > { %872 = vrot.lane.b32.xlu1 %v2699_v50, %s2409_s26  ;;  %v2265_v50 = vld [vmem:[%s3434_s2 + $0x8] sm:$0xff]   ;;  %v869_v47 = vsel %vm2658_vm13, %v2066_v41, %v868_v42  ;;  %vm1013_vm13 = vsmask.f32 7440  ;;  %v1055_v30 = vrot.slane %v1053_v38, 5 }
  0x58   : > { %870 = vrot.lane.b32.xlu0 %v2721_v3, %s2409_s26  ;;  %2150 = vmatprep.subr.bf16.mxu0 %v2265_v50  ;;  %v2267_v3 = vld [vmem:[%s3434_s2 + $0x10] ss:$0 sps:$4 sm:$0x33]   ;;  %vm2960_vm14 = vmor %vm1012_vm12, %vm1013_vm13 }
  0x59   : > { %2171 = vmatprep.subr.bf16.mxu1 %v2265_v50  ;;  %2151 = vmatpush3.bf16.msra.mxu0 %v2265_v50 }
  0x5a   : > { %2174 = vmatpush3.bf16.msra.mxu1 %v2265_v50  ;;  %2176 = vmatprep.subr.msk.bf16.mxu0 %vm1480_vm9, %v2267_v3  ;;  %v1063_v50 = vrot.slane %v1061_v1, 5 }
  0x5b   : > { %876 = vrot.lane.b32.xlu1 %v2787_v10, %s2409_s26  ;;  %2177 = vmatprep.subr.msk.bf16.mxu1 %vm1480_vm9, %v2267_v3 }
  0x5c   : > { %874 = vrot.lane.b32.xlu0 %v2740_v56, %s2409_s26  ;;  %v1482_v56 = vsel %vm1480_vm9, %v2267_v3, 0  ;;  %v1046_v3 = vrot.slane %v1044_v5, 4  ;;  %v1064_v32 = vor.u32 %v1063_v50, %v1060_v20 }
  0x5d   : > { %2153 = vmatpush3.bf16.msra.mxu0 %v1482_v56 }
  0x5e   : > { %2175 = vmatpush3.bf16.msra.mxu1 %v1482_v56  ;;  %v1049_v56 = vrot.slane %v1047_v7, 5 }
  0x5f   : > { %906 = vrot.lane.b32.xlu1 %v2597_v60, %s2410_s8 }
  0x60   : > { %904 = vrot.lane.b32.xlu0 %v2639_v19, %s2410_s8  ;;  %v1050_v37 = vor.u32 %v1049_v56, %v1046_v3 }
  0x63   : > { %910 = vrot.lane.b32.xlu1 %v2762_v36, %s2410_s8 }
  0x64   : > { %908 = vrot.lane.b32.xlu0 %v2682_v44, %s2410_s8 }
  0x67   : > { %940 = vrot.lane.b32.xlu1 %v2629_v17, %s2411_s30 }
  0x68   : > { %938 = vrot.lane.b32.xlu0 %v2668_v35, %s2411_s30 }
  0x6b   : > { %679 = vrot.lane.b32.xlu1 %v2762_v36, %s2404_s13 }
  0x6c   : > { %677 = vrot.lane.b32.xlu0 %v2682_v44, %s2404_s13 }
  0x6f   : > { %944 = vrot.lane.b32.xlu1 %v2747_v24, %s2411_s30 }
  0x70   : > { %942 = vrot.lane.b32.xlu0 %v2688_v46, %s2411_s30 }
  0x73   : > { %683 = vrot.lane.b32.xlu1 %v2769_v39, %s2404_s13 }
  0x74   : > { %681 = vrot.lane.b32.xlu0 %v2777_v49, %s2404_s13 }
  0x77   : > { %720 = vrot.lane.b32.xlu1 %v2747_v24, %s2405_s14 }
  0x78   : > { %718 = vrot.lane.b32.xlu0 %v2688_v46, %s2405_s14 }
  0x7b   : > { %724 = vrot.lane.b32.xlu1 %v2789_v43, %s2405_s14 }
  0x7c   : > { %722 = vrot.lane.b32.xlu0 %v2798_v59, %s2405_s14 }
  0x7f   : > { %766 = vrot.lane.b32.xlu1 %v2823_v18, %s2408_s17 }
  0x80   : > { %764 = vrot.lane.b32.xlu0 %v2787_v10, %s2408_s17  ;;  %v1033_v10 = vshll.u32 %v2627_v16, 16 }
  0x82   : > { %v1035_v62 = vrot.slane %v1033_v10, 5 }
  0x83   : > { %770 = vrot.lane.b32.xlu1 %v755_v29, %s2408_s17 }
  0x84   : > { %768 = vrot.lane.b32.xlu0 %v2812_v8, %s2408_s17  ;;  %v1036_v15 = vor.u32 %v1035_v62, %v1032_v45  ;;  %v1072_v45 = vshrl.u32 %v2682_v44, 16  ;;  %v1075_v62 = vshll.u32 %v2682_v44, 16 }
  0x86   : > { %v1037_v14 = vrot.slane %v1036_v15, 4  ;;  %v1077_v1 = vrot.slane %v1075_v62, 5 }
  0x87   : > { %800 = vrot.lane.b32.xlu1 %v2777_v49, %s2406_s15 }
  0x88   : > { %798 = vrot.lane.b32.xlu0 %v2762_v36, %s2406_s15 }
  0x8b   : > { %804 = vrot.lane.b32.xlu1 %v2897_v31, %s2406_s15 }
  0x8c   : > { %802 = vrot.lane.b32.xlu0 %v2769_v39, %s2406_s15 }
  0x8f   : > { %834 = vrot.lane.b32.xlu1 %v2798_v59, %s2407_s16 }
  0x90   : > { %832 = vrot.lane.b32.xlu0 %v2747_v24, %s2407_s16 }
  0x93   : > { %838 = vrot.lane.b32.xlu1 %v2868_v13, %s2407_s16 }
  0x94   : > { %836 = vrot.lane.b32.xlu0 %v2789_v43, %s2407_s16 }
  0x97   : > { %880 = vrot.lane.b32.xlu1 %v2812_v8, %s2409_s26  ;;  %v1025_v8 = vshll.u32 %v528_v63, 16 }
  0x98   : > { %878 = vrot.lane.b32.xlu0 %v2823_v18, %s2409_s26  ;;  %v531_v18 = vld [vmem:[#allocation2 + $0x38] sm:$0x1] }
  0x99   : > { %v1027_v9 = vrot.slane %v1025_v8, 5  ;;  %v1067_v28 = vshll.u32 %v531_v18, 16 }
  0x9b   : > { %884 = vrot.lane.b32.xlu1 %v869_v47, %s2409_s26  ;;  %v1069_v42 = vrot.slane %v1067_v28, 5  ;;  %v1042_v47 = vsel %vm2960_vm14, %v1037_v14, %v1041_v27 }
  0x9c   : > { %882 = vrot.lane.b32.xlu0 %v755_v29, %s2409_s26 }
  0x9f   : > { %914 = vrot.lane.b32.xlu1 %v2769_v39, %s2410_s8 }
  0xa0   : > { %912 = vrot.lane.b32.xlu0 %v2777_v49, %s2410_s8 }
  0xa1   : > { %v676_v33 = vpop.permute.xlu1 %675 }
  0xa2   : > { %v670_v51 = vpop.permute.xlu0 %669  ;;  %697 = vst.msk [vmem:[#allocation4 + $0xc] sm:$0xf] %vm693_vm10, %v676_v33  ;;  %v1065_v33 = vrot.slane %v1064_v32, 4  ;;  %v533_v32 = vld [vmem:[#allocation2 + $0x50] sm:$0x1] }
  0xa3   : > { %694 = vst.msk [vmem:[#allocation4] sm:$0xf] %vm693_vm10, %v670_v51  ;;  %918 = vrot.lane.b32.xlu1 %v2927_v48, %s2410_s8  ;;  %v1051_v51 = vrot.slane %v1050_v37, 4 }
  0xa4   : > { %916 = vrot.lane.b32.xlu0 %v2897_v31, %s2410_s8  ;;  %v2977_v10 = vsel %vm2960_vm14, %v1065_v33, %v1069_v42  ;;  %v1117_v33 = vshll.u32 %v2769_v39, 16 }
  0xa5   : > { %v713_v54 = vpop.permute.xlu1 %712 }
  0xa6   : > { %v672_v55 = vpop.permute.xlu0 %671 }
  0xa7   : > { %695 = vst.msk [vmem:[#allocation4 + $0x4] sm:$0xf] %vm693_vm10, %v672_v55  ;;  %948 = vrot.lane.b32.xlu1 %v2789_v43, %s2411_s30 }
  0xa8   : > { %946 = vrot.lane.b32.xlu0 %v2798_v59, %s2411_s30  ;;  %736 = vst.msk [vmem:[#allocation4 + $0x4] sm:$0xf] %vm734_vm11, %v713_v54  ;;  %v2981_v54 = vsel %vm2960_vm14, %v1051_v51, %v1055_v30  ;;  %v1100_v51 = vshrl.u32 %v2777_v49, 16  ;;  %v1103_v30 = vshll.u32 %v2777_v49, 16 }
  0xa9   : > { %v717_v6 = vpop.permute.xlu1 %716 }
  0xaa   : > { %v711_v11 = vpop.permute.xlu0 %710  ;;  %738 = vst.msk [vmem:[#allocation4 + $0xc] sm:$0xf] %vm734_vm11, %v717_v6  ;;  %v532_v6 = vld [vmem:[#allocation2 + $0x44] sm:$0x1] }
  0xab   : > { %735 = vst.msk [vmem:[#allocation4] sm:$0xf] %vm734_vm11, %v711_v11  ;;  %952 = vrot.lane.b32.xlu1 %v2899_v34, %s2411_s30  ;;  %v1081_v15 = vshll.u32 %v532_v6, 16 }
  0xac   : > { %950 = vrot.lane.b32.xlu0 %v2868_v13, %s2411_s30 }
  0xad   : > { %v674_v21 = vpop.permute.xlu1 %673  ;;  %v1083_v18 = vrot.slane %v1081_v15, 5 }
  0xae   : > { %v791_v22 = vpop.permute.xlu0 %790  ;;  %696 = vst.msk [vmem:[#allocation4 + $0x8] sm:$0xf] %vm693_vm10, %v674_v21 }
  0xaf   : > { %982 = vrot.lane.b32.xlu1 %v2610_v4, %s2404_s13 }
  0xb0   : > { %980 = vrot.lane.b32.xlu0 %v2647_v25, %s2404_s13  ;;  %v1028_v25 = vsel %vm2960_vm14, %v1023_v23, %v1027_v9  ;;  %v1086_v23 = vshrl.u32 %v2762_v36, 16 }
  0xb1   : > { %v793_v40 = vpop.permute.xlu1 %792 }
  0xb2   : > { %v795_v41 = vpop.permute.xlu0 %794 }
  0xb3   : > { %986 = vrot.lane.b32.xlu1 %v2629_v17, %s2404_s13 }
  0xb4   : > { %984 = vrot.lane.b32.xlu0 %v2668_v35, %s2404_s13 }
  0xb5   : > { %v797_v52 = vpop.permute.xlu1 %796 }
  0xb6   : > { %v715_v53 = vpop.permute.xlu0 %714 }
  0xb7   : > { %737 = vst.msk [vmem:[#allocation4 + $0x8] sm:$0xf] %vm734_vm11, %v715_v53  ;;  %1129 = vrot.lane.b32.xlu1 %v1042_v47, %s2405_s14 }
  0xb8   : > { %1127 = vrot.lane.b32.xlu0 %v1028_v25, %s2405_s14 }
  0xb9   : > { %v827_v55 = vpop.permute.xlu1 %826 }
  0xba   : > { %v757_v57 = vpop.permute.xlu0 %756 }
  0xbb   : > { %781 = vst.msk [vmem:[#allocation4] sm:$0xf] %vm780_vm15, %v757_v57  ;;  %1133 = vrot.lane.b32.xlu1 %v2977_v10, %s2405_s14  ;;  %v1119_v57 = vrot.slane %v1117_v33, 5  ;;  %v1334_v33 = vshrl.u32 %v2927_v48, 16 }
  0xbc   : > { %1131 = vrot.lane.b32.xlu0 %v2981_v54, %s2405_s14  ;;  %815 = vst.msk [vmem:[#allocation4] sm:$0xf] %vm814_vm1, %v791_v22 }
  0xbd   : > { %v759_v58 = vpop.permute.xlu1 %758 }
  0xbe   : > { %v761_v61 = vpop.permute.xlu0 %760  ;;  %782 = vst.msk [vmem:[#allocation4 + $0x4] sm:$0xf] %vm780_vm15, %v759_v58  ;;  %v1102_v58 = vrot.slane %v1100_v51, 4  ;;  %v1337_v51 = vshll.u32 %v2927_v48, 16 }
  0xbf   : > { %783 = vst.msk [vmem:[#allocation4 + $0x8] sm:$0xf] %vm780_vm15, %v761_v61  ;;  %1161 = vrot.lane.b32.xlu1 %v2639_v19, %s2408_s17  ;;  %v1105_v61 = vrot.slane %v1103_v30, 5 }
  0xc0   : > { %816 = vst.msk [vmem:[#allocation4 + $0x4] sm:$0xf] %vm814_vm1, %v793_v40  ;;  %817 = vst.msk [vmem:[#allocation4 + $0x8] sm:$0xf] %vm814_vm1, %v795_v41  ;;  %1159 = vrot.lane.b32.xlu0 %v2627_v16, %s2408_s17  ;;  %v1074_v16 = vrot.slane %v1072_v45, 4  ;;  %v1095_v40 = vshll.u32 %v533_v32, 16 }
  0xc1   : > { %850 = vst.msk [vmem:[#allocation4 + $0x4] sm:$0xf] %vm848_vm2, %v827_v55  ;;  %v763_v63 = vpop.permute.xlu1 %762 }
  0xc2   : > { %v825_v0 = vpop.permute.xlu0 %824  ;;  %784 = vst.msk [vmem:[#allocation4 + $0xc] sm:$0xf] %vm780_vm15, %v763_v63  ;;  %v1078_v11 = vor.u32 %v1077_v1, %v1074_v16  ;;  %v1097_v42 = vrot.slane %v1095_v40, 5  ;;  %v535_v63 = vld [vmem:[#allocation2 + $0x68] sm:$0x1]  ;;  %v1106_v1 = vor.u32 %v1105_v61, %v1102_v58 }
  0xc3   : > { %849 = vst.msk [vmem:[#allocation4] sm:$0xf] %vm848_vm2, %v825_v0  ;;  %1165 = vrot.lane.b32.xlu1 %v2682_v44, %s2408_s17  ;;  %v534_v0 = vld [vmem:[#allocation2 + $0x5c] sm:$0x1]  ;;  %v1123_v16 = vshll.u32 %v535_v63, 16 }
  0xc4   : > { %818 = vst.msk [vmem:[#allocation4 + $0xc] sm:$0xf] %vm814_vm1, %v797_v52  ;;  %1163 = vrot.lane.b32.xlu0 %v2597_v60, %s2408_s17  ;;  %v1079_v8 = vrot.slane %v1078_v11, 4 }
  0xc5   : > { %v831_v5 = vpop.permute.xlu1 %830  ;;  %v1125_v15 = vrot.slane %v1123_v16, 5 }
  0xc6   : > { %v829_v7 = vpop.permute.xlu0 %828  ;;  %852 = vst.msk [vmem:[#allocation4 + $0xc] sm:$0xf] %vm848_vm2, %v831_v5  ;;  %v1109_v5 = vshll.u32 %v534_v0, 16 }
  0xc7   : > { %851 = vst.msk [vmem:[#allocation4 + $0x8] sm:$0xf] %vm848_vm2, %v829_v7  ;;  %1193 = vrot.lane.b32.xlu1 %v2668_v35, %s2406_s15 }
  0xc8   : > { %1191 = vrot.lane.b32.xlu0 %v2610_v4, %s2406_s15  ;;  %v3026_v4 = vsel %vm2960_vm14, %v1079_v8, %v1083_v18 }
  0xc9   : > { %v873_v2 = vpop.permute.xlu1 %872 }
  0xca   : > { %v871_v12 = vpop.permute.xlu0 %870  ;;  %896 = vst.msk [vmem:[#allocation4 + $0x4] sm:$0xf] %vm894_vm3, %v873_v2  ;;  %v1107_v2 = vrot.slane %v1106_v1, 4 }
  0xcb   : > { %895 = vst.msk [vmem:[#allocation4] sm:$0xf] %vm894_vm3, %v871_v12  ;;  %1197 = vrot.lane.b32.xlu1 %v2688_v46, %s2406_s15  ;;  %v1111_v12 = vrot.slane %v1109_v5, 5 }
  0xcc   : > { %1195 = vrot.lane.b32.xlu0 %v2629_v17, %s2406_s15 }
  0xcd   : > { %v877_v20 = vpop.permute.xlu1 %876 }
  0xce   : > { %v875_v50 = vpop.permute.xlu0 %874  ;;  %898 = vst.msk [vmem:[#allocation4 + $0xc] sm:$0xf] %vm894_vm3, %v877_v20 }
  0xcf   : > { %897 = vst.msk [vmem:[#allocation4 + $0x8] sm:$0xf] %vm894_vm3, %v875_v50  ;;  %1239 = vrot.lane.b32.xlu1 %v2981_v54, %s2407_s16  ;;  %v3106_v50 = vsel %vm2960_vm14, %v1107_v2, %v1111_v12 }
  0xd0   : > { %1237 = vrot.lane.b32.xlu0 %v1042_v47, %s2407_s16  ;;  %v1114_v47 = vshrl.u32 %v2769_v39, 16 }
  0xd1   : > { %v907_v3 = vpop.permute.xlu1 %906 }
  0xd2   : > { %v905_v56 = vpop.permute.xlu0 %904  ;;  %930 = vst.msk [vmem:[#allocation4 + $0x4] sm:$0xf] %vm928_vm4, %v907_v3 }
  0xd3   : > { %929 = vst.msk [vmem:[#allocation4] sm:$0xf] %vm928_vm4, %v905_v56  ;;  %1243 = vrot.lane.b32.xlu1 %v3026_v4, %s2407_s16 }
  0xd4   : > { %1241 = vrot.lane.b32.xlu0 %v2977_v10, %s2407_s16 }
  0xd5   : > { %v911_v21 = vpop.permute.xlu1 %910 }
  0xd6   : > { %v909_v22 = vpop.permute.xlu0 %908  ;;  %932 = vst.msk [vmem:[#allocation4 + $0xc] sm:$0xf] %vm928_vm4, %v911_v21 }
  0xd7   : > { %931 = vst.msk [vmem:[#allocation4 + $0x8] sm:$0xf] %vm928_vm4, %v909_v22  ;;  %1271 = vrot.lane.b32.xlu1 %v2597_v60, %s2409_s26  ;;  %v1089_v60 = vshll.u32 %v2762_v36, 16  ;;  %v1224_v22 = vshrl.u32 %v2897_v31, 16 }
  0xd8   : > { %1269 = vrot.lane.b32.xlu0 %v2639_v19, %s2409_s26  ;;  %v1088_v19 = vrot.slane %v1086_v23, 4 }
  0xd9   : > { %v941_v26 = vpop.permute.xlu1 %940  ;;  %v1091_v14 = vrot.slane %v1089_v60, 5  ;;  %v1226_v60 = vrot.slane %v1224_v22, 4 }
  0xda   : > { %v939_v27 = vpop.permute.xlu0 %938  ;;  %964 = vst.msk [vmem:[#allocation4 + $0x4] sm:$0xf] %vm962_vm5, %v941_v26  ;;  %v1227_v26 = vshll.u32 %v2897_v31, 16 }
  0xdb   : > { %963 = vst.msk [vmem:[#allocation4] sm:$0xf] %vm962_vm5, %v939_v27  ;;  %1275 = vrot.lane.b32.xlu1 %v2762_v36, %s2409_s26 }
  0xdc   : > { %1273 = vrot.lane.b32.xlu0 %v2682_v44, %s2409_s26 }
  0xdd   : > { %v680_v9 = vpop.permute.xlu1 %679 }
  0xde   : > { %v678_v28 = vpop.permute.xlu0 %677  ;;  %699 = vst.msk [vmem:[#allocation4 + $0x14] sm:$0xf] %vm693_vm10, %v680_v9  ;;  %v1229_v9 = vrot.slane %v1227_v26, 5 }
  0xdf   : > { %698 = vst.msk [vmem:[#allocation4 + $0x10] sm:$0xf] %vm693_vm10, %v678_v28  ;;  %1303 = vrot.lane.b32.xlu1 %v2629_v17, %s2410_s8  ;;  %v1092_v17 = vor.u32 %v1091_v14, %v1088_v19  ;;  %v536_v19 = vld [vmem:[#allocation2 + $0x74] sm:$0x1] }
  0xe0   : > { %1301 = vrot.lane.b32.xlu0 %v2668_v35, %s2410_s8  ;;  %v1230_v14 = vor.u32 %v1229_v9, %v1226_v60  ;;  %v1233_v32 = vshll.u32 %v536_v19, 16 }
  0xe1   : > { %v945_v44 = vpop.permute.xlu1 %944  ;;  %v1093_v25 = vrot.slane %v1092_v17, 4 }
  0xe2   : > { %v943_v37 = vpop.permute.xlu0 %942  ;;  %v2266_v38 = vld [vmem:[#allocation4] sm:$0xff]   ;;  %966 = vst.msk [vmem:[#allocation4 + $0xc] sm:$0xf] %vm962_vm5, %v945_v44  ;;  %v1235_v17 = vrot.slane %v1233_v32, 5 }
  0xe3   : > { %965 = vst.msk [vmem:[#allocation4 + $0x8] sm:$0xf] %vm962_vm5, %v943_v37  ;;  %1307 = vrot.lane.b32.xlu1 %v2747_v24, %s2410_s8  ;;  %2154 = vmatprep.mubr.msk.bf16.mxu0 %vm1455_vm6, %v2266_v38  ;;  %v1231_v38 = vrot.slane %v1230_v14, 4 }
  0xe4   : > { %1305 = vrot.lane.b32.xlu0 %v2688_v46, %s2410_s8 }
  0xe5   : > { %v684_v35 = vpop.permute.xlu1 %683 }
  0xe6   : > { %v682_v41 = vpop.permute.xlu0 %681  ;;  %701 = vst.msk [vmem:[#allocation4 + $0x1c] sm:$0xf] %vm693_vm10, %v684_v35 }
  0xe7   : > { %700 = vst.msk [vmem:[#allocation4 + $0x18] sm:$0xf] %vm693_vm10, %v682_v41  ;;  %1349 = vrot.lane.b32.xlu1 %v2977_v10, %s2411_s30  ;;  %v3079_v10 = vsel %vm2960_vm14, %v1093_v25, %v1097_v42 }
  0xe8   : > { %1347 = vrot.lane.b32.xlu0 %v2981_v54, %s2411_s30  ;;  %v1116_v54 = vrot.slane %v1114_v47, 4 }
  0xe9   : > { %v721_v52 = vpop.permute.xlu1 %720 }
  0xea   : > { %v719_v53 = vpop.permute.xlu0 %718  ;;  %v2268_v55 = vld [vmem:[#allocation4 + $0x8] sm:$0xff]   ;;  %740 = vst.msk [vmem:[#allocation4 + $0x14] sm:$0xf] %vm734_vm11, %v721_v52 }
  0xeb   : > { %739 = vst.msk [vmem:[#allocation4 + $0x10] sm:$0xf] %vm734_vm11, %v719_v53  ;;  %990 = vrot.lane.b32.xlu1 %v2747_v24, %s2404_s13  ;;  %2155 = vmatmul.mubr.msk.bf16.vlgmr.msra.gmra.mrb[0].mxu0 %vm1455_vm6, %v2268_v55  ;;  %v1339_v53 = vrot.slane %v1337_v51, 5 }
  0xec   : > { %988 = vrot.lane.b32.xlu0 %v2688_v46, %s2404_s13  ;;  %v1120_v46 = vor.u32 %v1119_v57, %v1116_v54 }
  0xed   : > { %v725_v45 = vpop.permute.xlu1 %724 }
  0xee   : > { %v723_v62 = vpop.permute.xlu0 %722  ;;  %742 = vst.msk [vmem:[#allocation4 + $0x1c] sm:$0xf] %vm734_vm11, %v725_v45  ;;  %v1121_v11 = vrot.slane %v1120_v46, 4 }
  0xef   : > { %741 = vst.msk [vmem:[#allocation4 + $0x18] sm:$0xf] %vm734_vm11, %v723_v62  ;;  %1353 = vrot.lane.b32.xlu1 %v3079_v10, %s2411_s30 }
  0xf0   : > { %1351 = vrot.lane.b32.xlu0 %v3026_v4, %s2411_s30  ;;  %v3102_v20 = vsel %vm2960_vm14, %v1121_v11, %v1125_v15 }
  0xf1   : > { %v767_v7 = vpop.permute.xlu1 %766 }
  0xf2   : > { %v765_v6 = vpop.permute.xlu0 %764  ;;  %786 = vst.msk [vmem:[#allocation4 + $0x14] sm:$0xf] %vm780_vm15, %v767_v7 }
  0xf3   : > { %785 = vst.msk [vmem:[#allocation4 + $0x10] sm:$0xf] %vm780_vm15, %v765_v6  ;;  %994 = vrot.lane.b32.xlu1 %v2789_v43, %s2404_s13 }
  0xf4   : > { %992 = vrot.lane.b32.xlu0 %v2798_v59, %s2404_s13  ;;  %s3204_s13 = sand.u32 1, %s2377_s19  }
  0xf5   : > { %v771_v8 = vpop.permute.xlu1 %770 }
  0xf6   : > { %v769_v18 = vpop.permute.xlu0 %768  ;;  %788 = vst.msk [vmem:[#allocation4 + $0x1c] sm:$0xf] %vm780_vm15, %v771_v8 }
  0xf7   : > { %787 = vst.msk [vmem:[#allocation4 + $0x18] sm:$0xf] %vm780_vm15, %v769_v18  ;;  %1137 = vrot.lane.b32.xlu1 %v3079_v10, %s2405_s14 }
  0xf8   : > { %1135 = vrot.lane.b32.xlu0 %v3026_v4, %s2405_s14 }
  0xf9   : > { %v801_v3 = vpop.permute.xlu1 %800 }
  0xfa   : > { %v799_v56 = vpop.permute.xlu0 %798  ;;  %820 = vst.msk [vmem:[#allocation4 + $0x14] sm:$0xf] %vm814_vm1, %v801_v3 }
  0xfb   : > { %819 = vst.msk [vmem:[#allocation4 + $0x10] sm:$0xf] %vm814_vm1, %v799_v56  ;;  %1141 = vrot.lane.b32.xlu1 %v3102_v20, %s2405_s14 }
  0xfc   : > { %1139 = vrot.lane.b32.xlu0 %v3106_v50, %s2405_s14  ;;  %s2051_s14 = sshll.u32 %s3204_s13, 6 }
  0xfd   : > { %v805_v4 = vpop.permute.xlu1 %804 }
  0xfe   : > { %v803_v21 = vpop.permute.xlu0 %802  ;;  %822 = vst.msk [vmem:[#allocation4 + $0x1c] sm:$0xf] %vm814_vm1, %v805_v4 }
  0xff   : > { %821 = vst.msk [vmem:[#allocation4 + $0x18] sm:$0xf] %vm814_vm1, %v803_v21  ;;  %1169 = vrot.lane.b32.xlu1 %v2777_v49, %s2408_s17 }
 0x100   : > { %1167 = vrot.lane.b32.xlu0 %v2762_v36, %s2408_s17 }
 0x101   : > { %v835_v27 = vpop.permute.xlu1 %834 }
 0x102   : > { %v833_v23 = vpop.permute.xlu0 %832  ;;  %854 = vst.msk [vmem:[#allocation4 + $0x14] sm:$0xf] %vm848_vm2, %v835_v27 }
 0x103   : > { %853 = vst.msk [vmem:[#allocation4 + $0x10] sm:$0xf] %vm848_vm2, %v833_v23  ;;  %1173 = vrot.lane.b32.xlu1 %v2897_v31, %s2408_s17 }
 0x104   : > { %1171 = vrot.lane.b32.xlu0 %v2769_v39, %s2408_s17  ;;  %s265_s17 = scalar_lea.vmem [#allocation8], %s3204_s13 }
 0x105   : > { %v839_v28 = vpop.permute.xlu1 %838 }
 0x106   : > { %v837_v36 = vpop.permute.xlu0 %836  ;;  %856 = vst.msk [vmem:[#allocation4 + $0x1c] sm:$0xf] %vm848_vm2, %v839_v28 }
 0x107   : > { %855 = vst.msk [vmem:[#allocation4 + $0x18] sm:$0xf] %vm848_vm2, %v837_v36  ;;  %1201 = vrot.lane.b32.xlu1 %v2798_v59, %s2406_s15 }
 0x108   : > { %1199 = vrot.lane.b32.xlu0 %v2747_v24, %s2406_s15  ;;  %v1236_v24 = vsel %vm2960_vm14, %v1231_v38, %v1235_v17 }
 0x109   : > { %v881_v44 = vpop.permute.xlu1 %880 }
 0x10a   : > { %v879_v37 = vpop.permute.xlu0 %878  ;;  %900 = vst.msk [vmem:[#allocation4 + $0x14] sm:$0xf] %vm894_vm3, %v881_v44 }
 0x10b   : > { %899 = vst.msk [vmem:[#allocation4 + $0x10] sm:$0xf] %vm894_vm3, %v879_v37  ;;  %1205 = vrot.lane.b32.xlu1 %v2868_v13, %s2406_s15 }
 0x10c   : > { %1203 = vrot.lane.b32.xlu0 %v2789_v43, %s2406_s15  ;;  %s3259_s15 = scalar_lea.vmem [#allocation5], %s2051_s14 }
 0x10d   : > { %v885_v40 = vpop.permute.xlu1 %884 }
 0x10e   : > { %v883_v35 = vpop.permute.xlu0 %882  ;;  %902 = vst.msk [vmem:[#allocation4 + $0x1c] sm:$0xf] %vm894_vm3, %v885_v40 }
 0x10f   : > { %901 = vst.msk [vmem:[#allocation4 + $0x18] sm:$0xf] %vm894_vm3, %v883_v35  ;;  %1247 = vrot.lane.b32.xlu1 %v3106_v50, %s2407_s16 }
 0x110   : > { %1245 = vrot.lane.b32.xlu0 %v3079_v10, %s2407_s16  ;;  %v537_v10 = vld [vmem:[#allocation2 + $0x80] sm:$0x1] }
 0x111   : > { %v915_v41 = vpop.permute.xlu1 %914 }
 0x112   : > { %v913_v25 = vpop.permute.xlu0 %912  ;;  %934 = vst.msk [vmem:[#allocation4 + $0x14] sm:$0xf] %vm928_vm4, %v915_v41 }
 0x113   : > { %933 = vst.msk [vmem:[#allocation4 + $0x10] sm:$0xf] %vm928_vm4, %v913_v25  ;;  %1251 = vrot.lane.b32.xlu1 %v1236_v24, %s2407_s16 }
 0x114   : > { %1249 = vrot.lane.b32.xlu0 %v3102_v20, %s2407_s16  ;;  %s259_s16 = scalar_lea.vmem [#allocation6], %s3204_s13 }
 0x115   : > { %v919_v42 = vpop.permute.xlu1 %918 }
 0x116   : > { %v917_v47 = vpop.permute.xlu0 %916  ;;  %936 = vst.msk [vmem:[#allocation4 + $0x1c] sm:$0xf] %vm928_vm4, %v919_v42 }
 0x117   : > { %935 = vst.msk [vmem:[#allocation4 + $0x18] sm:$0xf] %vm928_vm4, %v917_v47  ;;  %1279 = vrot.lane.b32.xlu1 %v2769_v39, %s2409_s26  ;;  %v1336_v39 = vrot.slane %v1334_v33, 4 }
 0x118   : > { %1277 = vrot.lane.b32.xlu0 %v2777_v49, %s2409_s26 }
 0x119   : > { %v949_v30 = vpop.permute.xlu1 %948  ;;  %v1340_v54 = vor.u32 %v1339_v53, %v1336_v39 }
 0x11a   : > { %v947_v52 = vpop.permute.xlu0 %946  ;;  %968 = vst.msk [vmem:[#allocation4 + $0x14] sm:$0xf] %vm962_vm5, %v949_v30 }
 0x11b   : > { %967 = vst.msk [vmem:[#allocation4 + $0x10] sm:$0xf] %vm962_vm5, %v947_v52  ;;  %1283 = vrot.lane.b32.xlu1 %v2927_v48, %s2409_s26  ;;  %v1343_v48 = vshll.u32 %v537_v10, 16 }
 0x11c   : > { %1281 = vrot.lane.b32.xlu0 %v2897_v31, %s2409_s26 }
 0x11d   : > { %v953_v55 = vpop.permute.xlu1 %952  ;;  %v1345_v61 = vrot.slane %v1343_v48, 5 }
 0x11e   : > { %v951_v49 = vpop.permute.xlu0 %950  ;;  %970 = vst.msk [vmem:[#allocation4 + $0x1c] sm:$0xf] %vm962_vm5, %v953_v55 }
 0x11f   : > { %969 = vst.msk [vmem:[#allocation4 + $0x18] sm:$0xf] %vm962_vm5, %v951_v49  ;;  %1311 = vrot.lane.b32.xlu1 %v2789_v43, %s2410_s8  ;;  %v1341_v43 = vrot.slane %v1340_v54, 4 }
 0x120   : > { %1309 = vrot.lane.b32.xlu0 %v2798_v59, %s2410_s8 }
 0x121   : > { %v983_v57 = vpop.permute.xlu1 %982 }
 0x122   : > { %v981_v58 = vpop.permute.xlu0 %980  ;;  %v2269_v31 = vld [vmem:[#allocation4 + $0x10] sm:$0xff]   ;;  %1005 = vst.msk [vmem:[#allocation4 + $0x24] sm:$0xf] %vm693_vm10, %v983_v57 }
 0x123   : > { %1004 = vst.msk [vmem:[#allocation4 + $0x20] sm:$0xf] %vm693_vm10, %v981_v58  ;;  %1315 = vrot.lane.b32.xlu1 %v2899_v34, %s2410_s8  ;;  %2158 = vmatprep.mubr.msk.bf16.mxu0 %vm1455_vm6, %v2269_v31 }
 0x124   : > { %1313 = vrot.lane.b32.xlu0 %v2868_v13, %s2410_s8  ;;  %v1346_v13 = vsel %vm2960_vm14, %v1341_v43, %v1345_v61  ;;  %s1775_s8 = scalar_lea.vmem (%p2495_p3), %s3435_s3, %s2113_s27 }
 0x125   : > { %v987_v59 = vpop.permute.xlu1 %986 }
 0x126   : > { %v985_v45 = vpop.permute.xlu0 %984  ;;  %v2270_v62 = vld [vmem:[#allocation4 + $0x18] sm:$0xff]   ;;  %1007 = vst.msk [vmem:[#allocation4 + $0x2c] sm:$0xf] %vm693_vm10, %v987_v59 }
 0x127   : > { %1006 = vst.msk [vmem:[#allocation4 + $0x28] sm:$0xf] %vm693_vm10, %v985_v45  ;;  %1357 = vrot.lane.b32.xlu1 %v3102_v20, %s2411_s30  ;;  %2159 = vmatmul.mubr.msk.bf16.gmra.mrb[4].mxu0 %vm1455_vm6, %v2270_v62 }
 0x128   : > { %1355 = vrot.lane.b32.xlu0 %v3106_v50, %s2411_s30 }
 0x129   : > { %v1130_v34 = vpop.permute.xlu1 %1129 }
 0x12a   : > { %v1128_v63 = vpop.permute.xlu0 %1127  ;;  %1152 = vst.msk [vmem:[#allocation4 + $0x24] sm:$0xf] %vm734_vm11, %v1130_v34 }
 0x12b   : > { %1151 = vst.msk [vmem:[#allocation4 + $0x20] sm:$0xf] %vm734_vm11, %v1128_v63  ;;  %1361 = vrot.lane.b32.xlu1 %v1346_v13, %s2411_s30 }
 0x12c   : > { %1359 = vrot.lane.b32.xlu0 %v1236_v24, %s2411_s30 }
 0x12d   : > { %v1134_v0 = vpop.permute.xlu1 %1133 }
 0x12e   : > { %v1132_v46 = vpop.permute.xlu0 %1131  ;;  %1154 = vst.msk [vmem:[#allocation4 + $0x2c] sm:$0xf] %vm734_vm11, %v1134_v0 }
 0x12f   : > { %1153 = vst.msk [vmem:[#allocation4 + $0x28] sm:$0xf] %vm734_vm11, %v1132_v46 }
 0x131   : > { %v1162_v16 = vpop.permute.xlu1 %1161 }
 0x132   : > { %v1160_v1 = vpop.permute.xlu0 %1159  ;;  %1184 = vst.msk [vmem:[#allocation4 + $0x24] sm:$0xf] %vm780_vm15, %v1162_v16 }
 0x133   : > { %1183 = vst.msk [vmem:[#allocation4 + $0x20] sm:$0xf] %vm780_vm15, %v1160_v1 }
 0x135   : > { %v1166_v29 = vpop.permute.xlu1 %1165 }
 0x136   : > { %v1164_v5 = vpop.permute.xlu0 %1163  ;;  %1186 = vst.msk [vmem:[#allocation4 + $0x2c] sm:$0xf] %vm780_vm15, %v1166_v29 }
 0x137   : > { %1185 = vst.msk [vmem:[#allocation4 + $0x28] sm:$0xf] %vm780_vm15, %v1164_v5 }
 0x139   : > { %v1194_v7 = vpop.permute.xlu1 %1193 }
 0x13a   : > { %v1192_v6 = vpop.permute.xlu0 %1191  ;;  %1216 = vst.msk [vmem:[#allocation4 + $0x24] sm:$0xf] %vm814_vm1, %v1194_v7 }
 0x13b   : > { %1215 = vst.msk [vmem:[#allocation4 + $0x20] sm:$0xf] %vm814_vm1, %v1192_v6 }
 0x13d   : > { %v1198_v11 = vpop.permute.xlu1 %1197 }
 0x13e   : > { %v1196_v15 = vpop.permute.xlu0 %1195  ;;  %1218 = vst.msk [vmem:[#allocation4 + $0x2c] sm:$0xf] %vm814_vm1, %v1198_v11 }
 0x13f   : > { %1217 = vst.msk [vmem:[#allocation4 + $0x28] sm:$0xf] %vm814_vm1, %v1196_v15 }
 0x141   : > { %v1240_v2 = vpop.permute.xlu1 %1239 }
 0x142   : > { %v1238_v12 = vpop.permute.xlu0 %1237  ;;  %1262 = vst.msk [vmem:[#allocation4 + $0x24] sm:$0xf] %vm848_vm2, %v1240_v2 }
 0x143   : > { %1261 = vst.msk [vmem:[#allocation4 + $0x20] sm:$0xf] %vm848_vm2, %v1238_v12 }
 0x145   : > { %v1244_v8 = vpop.permute.xlu1 %1243 }
 0x146   : > { %v1242_v18 = vpop.permute.xlu0 %1241  ;;  %1264 = vst.msk [vmem:[#allocation4 + $0x2c] sm:$0xf] %vm848_vm2, %v1244_v8 }
 0x147   : > { %1263 = vst.msk [vmem:[#allocation4 + $0x28] sm:$0xf] %vm848_vm2, %v1242_v18 }
 0x149   : > { %v1272_v20 = vpop.permute.xlu1 %1271 }
 0x14a   : > { %v1270_v50 = vpop.permute.xlu0 %1269  ;;  %1294 = vst.msk [vmem:[#allocation4 + $0x24] sm:$0xf] %vm894_vm3, %v1272_v20 }
 0x14b   : > { %1293 = vst.msk [vmem:[#allocation4 + $0x20] sm:$0xf] %vm894_vm3, %v1270_v50 }
 0x14d   : > { %v1276_v3 = vpop.permute.xlu1 %1275 }
 0x14e   : > { %v1274_v56 = vpop.permute.xlu0 %1273  ;;  %1296 = vst.msk [vmem:[#allocation4 + $0x2c] sm:$0xf] %vm894_vm3, %v1276_v3 }
 0x14f   : > { %1295 = vst.msk [vmem:[#allocation4 + $0x28] sm:$0xf] %vm894_vm3, %v1274_v56 }
 0x151   : > { %v1304_v4 = vpop.permute.xlu1 %1303 }
 0x152   : > { %v1302_v21 = vpop.permute.xlu0 %1301  ;;  %1326 = vst.msk [vmem:[#allocation4 + $0x24] sm:$0xf] %vm928_vm4, %v1304_v4 }
 0x153   : > { %1325 = vst.msk [vmem:[#allocation4 + $0x20] sm:$0xf] %vm928_vm4, %v1302_v21 }
 0x155   : > { %v1308_v22 = vpop.permute.xlu1 %1307 }
 0x156   : > { %v1306_v26 = vpop.permute.xlu0 %1305  ;;  %1328 = vst.msk [vmem:[#allocation4 + $0x2c] sm:$0xf] %vm928_vm4, %v1308_v22 }
 0x157   : > { %1327 = vst.msk [vmem:[#allocation4 + $0x28] sm:$0xf] %vm928_vm4, %v1306_v26 }
 0x159   : > { %v1350_v27 = vpop.permute.xlu1 %1349 }
 0x15a   : > { %v1348_v23 = vpop.permute.xlu0 %1347  ;;  %1372 = vst.msk [vmem:[#allocation4 + $0x24] sm:$0xf] %vm962_vm5, %v1350_v27 }
 0x15b   : > { %1371 = vst.msk [vmem:[#allocation4 + $0x20] sm:$0xf] %vm962_vm5, %v1348_v23 }
 0x15d   : > { %v991_v60 = vpop.permute.xlu1 %990 }
 0x15e   : > { %v989_v9 = vpop.permute.xlu0 %988  ;;  %1009 = vst.msk [vmem:[#allocation4 + $0x34] sm:$0xf] %vm693_vm10, %v991_v60 }
 0x15f   : > { %1008 = vst.msk [vmem:[#allocation4 + $0x30] sm:$0xf] %vm693_vm10, %v989_v9 }
 0x161   : > { %v1354_v28 = vpop.permute.xlu1 %1353 }
 0x162   : > { %v1352_v36 = vpop.permute.xlu0 %1351  ;;  %v2271_v19 = vld [vmem:[#allocation4 + $0x20] sm:$0xff]   ;;  %1374 = vst.msk [vmem:[#allocation4 + $0x2c] sm:$0xf] %vm962_vm5, %v1354_v28 }
 0x163   : > { %1373 = vst.msk [vmem:[#allocation4 + $0x28] sm:$0xf] %vm962_vm5, %v1352_v36  ;;  %2162 = vmatprep.mubr.msk.bf16.mxu1 %vm1455_vm6, %v2271_v19 }
 0x165   : > { %v995_v14 = vpop.permute.xlu1 %994 }
 0x166   : > { %v993_v32 = vpop.permute.xlu0 %992  ;;  %1011 = vst.msk [vmem:[#allocation4 + $0x3c] sm:$0xf] %vm693_vm10, %v995_v14 }
 0x167   : > { %1010 = vst.msk [vmem:[#allocation4 + $0x38] sm:$0xf] %vm693_vm10, %v993_v32 }
 0x169   : > { %v1138_v44 = vpop.permute.xlu1 %1137 }
 0x16a   : > { %v1136_v37 = vpop.permute.xlu0 %1135  ;;  %v2272_v38 = vld [vmem:[#allocation4 + $0x28] sm:$0xff]   ;;  %1156 = vst.msk [vmem:[#allocation4 + $0x34] sm:$0xf] %vm734_vm11, %v1138_v44 }
 0x16b   : > { %1155 = vst.msk [vmem:[#allocation4 + $0x30] sm:$0xf] %vm734_vm11, %v1136_v37  ;;  %2163 = vmatmul.mubr.msk.bf16.vlgmr.msra.gmra.mrb[0].mxu1 %vm1455_vm6, %v2272_v38 }
 0x16d   : > { %v1142_v17 = vpop.permute.xlu1 %1141 }
 0x16e   : > { %v1140_v40 = vpop.permute.xlu0 %1139  ;;  %1158 = vst.msk [vmem:[#allocation4 + $0x3c] sm:$0xf] %vm734_vm11, %v1142_v17 }
 0x16f   : > { %1157 = vst.msk [vmem:[#allocation4 + $0x38] sm:$0xf] %vm734_vm11, %v1140_v40 }
 0x171   : > { %v1170_v35 = vpop.permute.xlu1 %1169 }
 0x172   : > { %v1168_v24 = vpop.permute.xlu0 %1167  ;;  %1188 = vst.msk [vmem:[#allocation4 + $0x34] sm:$0xf] %vm780_vm15, %v1170_v35 }
 0x173   : > { %1187 = vst.msk [vmem:[#allocation4 + $0x30] sm:$0xf] %vm780_vm15, %v1168_v24 }
 0x175   : > { %v1174_v41 = vpop.permute.xlu1 %1173 }
 0x176   : > { %v1172_v25 = vpop.permute.xlu0 %1171  ;;  %1190 = vst.msk [vmem:[#allocation4 + $0x3c] sm:$0xf] %vm780_vm15, %v1174_v41 }
 0x177   : > { %1189 = vst.msk [vmem:[#allocation4 + $0x38] sm:$0xf] %vm780_vm15, %v1172_v25 }
 0x179   : > { %v1202_v42 = vpop.permute.xlu1 %1201 }
 0x17a   : > { %v1200_v47 = vpop.permute.xlu0 %1199  ;;  %1220 = vst.msk [vmem:[#allocation4 + $0x34] sm:$0xf] %vm814_vm1, %v1202_v42 }
 0x17b   : > { %1219 = vst.msk [vmem:[#allocation4 + $0x30] sm:$0xf] %vm814_vm1, %v1200_v47 }
 0x17d   : > { %v1206_v33 = vpop.permute.xlu1 %1205 }
 0x17e   : > { %v1204_v51 = vpop.permute.xlu0 %1203  ;;  %1222 = vst.msk [vmem:[#allocation4 + $0x3c] sm:$0xf] %vm814_vm1, %v1206_v33 }
 0x17f   : > { %1221 = vst.msk [vmem:[#allocation4 + $0x38] sm:$0xf] %vm814_vm1, %v1204_v51 }
 0x181   : > { %v1248_v30 = vpop.permute.xlu1 %1247 }
 0x182   : > { %v1246_v52 = vpop.permute.xlu0 %1245  ;;  %1266 = vst.msk [vmem:[#allocation4 + $0x34] sm:$0xf] %vm848_vm2, %v1248_v30 }
 0x183   : > { %1265 = vst.msk [vmem:[#allocation4 + $0x30] sm:$0xf] %vm848_vm2, %v1246_v52 }
 0x185   : > { %v1252_v39 = vpop.permute.xlu1 %1251 }
 0x186   : > { %v1250_v53 = vpop.permute.xlu0 %1249  ;;  %1268 = vst.msk [vmem:[#allocation4 + $0x3c] sm:$0xf] %vm848_vm2, %v1252_v39 }
 0x187   : > { %1267 = vst.msk [vmem:[#allocation4 + $0x38] sm:$0xf] %vm848_vm2, %v1250_v53 }
 0x189   : > { %v1280_v55 = vpop.permute.xlu1 %1279 }
 0x18a   : > { %v1278_v49 = vpop.permute.xlu0 %1277  ;;  %1298 = vst.msk [vmem:[#allocation4 + $0x34] sm:$0xf] %vm894_vm3, %v1280_v55 }
 0x18b   : > { %1297 = vst.msk [vmem:[#allocation4 + $0x30] sm:$0xf] %vm894_vm3, %v1278_v49 }
 0x18d   : > { %v1284_v10 = vpop.permute.xlu1 %1283 }
 0x18e   : > { %v1282_v54 = vpop.permute.xlu0 %1281  ;;  %1300 = vst.msk [vmem:[#allocation4 + $0x3c] sm:$0xf] %vm894_vm3, %v1284_v10 }
 0x18f   : > { %1299 = vst.msk [vmem:[#allocation4 + $0x38] sm:$0xf] %vm894_vm3, %v1282_v54 }
 0x191   : > { %v1312_v48 = vpop.permute.xlu1 %1311 }
 0x192   : > { %v1310_v57 = vpop.permute.xlu0 %1309  ;;  %1330 = vst.msk [vmem:[#allocation4 + $0x34] sm:$0xf] %vm928_vm4, %v1312_v48 }
 0x193   : > { %1329 = vst.msk [vmem:[#allocation4 + $0x30] sm:$0xf] %vm928_vm4, %v1310_v57 }
 0x195   : > { %v1316_v58 = vpop.permute.xlu1 %1315 }
 0x196   : > { %v1314_v31 = vpop.permute.xlu0 %1313  ;;  %1332 = vst.msk [vmem:[#allocation4 + $0x3c] sm:$0xf] %vm928_vm4, %v1316_v58 }
 0x197   : > { %1331 = vst.msk [vmem:[#allocation4 + $0x38] sm:$0xf] %vm928_vm4, %v1314_v31 }
 0x199   : > { %v1358_v43 = vpop.permute.xlu1 %1357 }
 0x19a   : > { %v1356_v61 = vpop.permute.xlu0 %1355  ;;  %1376 = vst.msk [vmem:[#allocation4 + $0x34] sm:$0xf] %vm962_vm5, %v1358_v43 }
 0x19b   : > { %1375 = vst.msk [vmem:[#allocation4 + $0x30] sm:$0xf] %vm962_vm5, %v1356_v61 }
 0x19d   : > { %v1362_v59 = vpop.permute.xlu1 %1361 }
 0x19e   : > { %v1360_v45 = vpop.permute.xlu0 %1359  ;;  %1378 = vst.msk [vmem:[#allocation4 + $0x3c] sm:$0xf] %vm962_vm5, %v1362_v59 }
 0x19f   : > { %1377 = vst.msk [vmem:[#allocation4 + $0x38] sm:$0xf] %vm962_vm5, %v1360_v45 }
 0x1a2   : > { %v2273_v62 = vld [vmem:[#allocation4 + $0x30] sm:$0xff]  }
 0x1a3   : > { %2166 = vmatprep.mubr.msk.bf16.mxu1 %vm1455_vm6, %v2273_v62 }
 0x1a6   : > { %v2274_v13 = vld [vmem:[#allocation4 + $0x38] sm:$0xff]  }
 0x1a7   : > { %2167 = vmatmul.mubr.msk.bf16.gmra.mrb[4].mxu1 %vm1455_vm6, %v2274_v13 }
 0x1be   : > { %v2156_v34 = vpop.f32.mrb[0].mxu0 }
 0x1bf   : > { %v2123_v63 = vpack.c.bf16 %v2156_v34, %v2156_v34  ;;  %v1518_v0 = vpop.f32.mrb[1].mxu0  ;;  %v1704_v29 = vmul.f32 %v2156_v34, %v2156_v34  ;;  %v1666_v8 = vsel %vm1662_vm7, %v2156_v34, 0.0 }
 0x1c0   : > { %v2121_v46 = vpack.c.bf16 %v1518_v0, %v1518_v0  ;;  %v1702_v16 = vmul.f32 %v1518_v0, %v1518_v0  ;;  %v2157_v1 = vpop.f32.mrb[2].mxu0  ;;  %v1663_v6 = vsel %vm1662_vm7, %v1518_v0, 0.0 }
 0x1c1   : > { %1615 = vst.msk [vmem:[%s3259_s15 + $0x8] sm:$0xf] %vm376_vm0, %v2123_v63  ;;  %v2124_v5 = vpack.c.bf16 %v2157_v1, %v2157_v1  ;;  %v1521_v7 = vpop.f32.mrb[3].mxu0  ;;  %v1705_v20 = vmul.f32 %v2157_v1, %v2157_v1  ;;  %v1721_v4 = vsel %vm1662_vm7, %v1704_v29, 0.0  ;;  %v1668_v21 = vsel %vm1662_vm7, %v2157_v1, 0.0 }
 0x1c2   : > { %1613 = vst.msk [vmem:[%s3259_s15] sm:$0xf] %vm376_vm0, %v2121_v46  ;;  %v2122_v11 = vpack.c.bf16 %v1521_v7, %v1521_v7  ;;  %v1664_v15 = vsel %vm1662_vm7, %v1521_v7, 0.0  ;;  %v1703_v2 = vmul.f32 %v1521_v7, %v1521_v7  ;;  %v1718_v18 = vsel %vm1662_vm7, %v1702_v16, 0.0 }
 0x1c3   : > { %1616 = vst.msk [vmem:[%s3259_s15 + $0xc] sm:$0xf] %vm376_vm0, %v2124_v5  ;;  %v1665_v12 = vadd.f32 %v1664_v15, %v1663_v6  ;;  %v1723_v27 = vsel %vm1662_vm7, %v1705_v20, 0.0 }
 0x1c4   : > { %1614 = vst.msk [vmem:[%s3259_s15 + $0x4] sm:$0xf] %vm376_vm0, %v2122_v11  ;;  %v1719_v50 = vsel %vm1662_vm7, %v1703_v2, 0.0 }
 0x1c5   : > { %v1667_v3 = vadd.f32 %v1666_v8, %v1665_v12  ;;  %v1720_v56 = vadd.f32 %v1719_v50, %v1718_v18 }
 0x1c7   : > { %v1722_v22 = vadd.f32 %v1721_v4, %v1720_v56  ;;  %v1669_v26 = vadd.f32 %v1668_v21, %v1667_v3 }
 0x1c9   : > { %v1724_v23 = vadd.f32 %v1723_v27, %v1722_v22 }
 0x1fa   : > { %v2160_v60 = vpop.f32.mrb[4].mxu0 }
 0x1fb   : > { %v2127_v9 = vpack.c.bf16 %v2160_v60, %v2160_v60  ;;  %v1534_v28 = vpop.f32.mrb[5].mxu0  ;;  %v1708_v24 = vmul.f32 %v2160_v60, %v2160_v60  ;;  %v1674_v47 = vsel %vm1662_vm7, %v2160_v60, 0.0 }
 0x1fc   : > { %v2125_v36 = vpack.c.bf16 %v1534_v28, %v1534_v28  ;;  %v1670_v19 = vsel %vm1662_vm7, %v1534_v28, 0.0  ;;  %v1706_v14 = vmul.f32 %v1534_v28, %v1534_v28  ;;  %v2161_v32 = vpop.f32.mrb[6].mxu0 }
 0x1fd   : > { %1619 = vst.msk [vmem:[%s3259_s15 + $0x18] sm:$0xf] %vm376_vm0, %v2127_v9  ;;  %v1671_v44 = vadd.f32 %v1670_v19, %v1669_v26  ;;  %v2128_v37 = vpack.c.bf16 %v2161_v32, %v2161_v32  ;;  %v1537_v38 = vpop.f32.mrb[7].mxu0  ;;  %v1709_v33 = vmul.f32 %v2161_v32, %v2161_v32  ;;  %v1676_v52 = vsel %vm1662_vm7, %v2161_v32, 0.0 }
 0x1fe   : > { %1617 = vst.msk [vmem:[%s3259_s15 + $0x10] sm:$0xf] %vm376_vm0, %v2125_v36  ;;  %v1725_v17 = vsel %vm1662_vm7, %v1706_v14, 0.0  ;;  %v2126_v40 = vpack.c.bf16 %v1537_v38, %v1537_v38  ;;  %v1672_v35 = vsel %vm1662_vm7, %v1537_v38, 0.0  ;;  %v1707_v42 = vmul.f32 %v1537_v38, %v1537_v38 }
 0x1ff   : > { %v1726_v41 = vadd.f32 %v1725_v17, %v1724_v23  ;;  %1620 = vst.msk [vmem:[%s3259_s15 + $0x1c] sm:$0xf] %vm376_vm0, %v2128_v37  ;;  %v1673_v25 = vadd.f32 %v1672_v35, %v1671_v44  ;;  %v1729_v53 = vsel %vm1662_vm7, %v1708_v24, 0.0  ;;  %v1731_v10 = vsel %vm1662_vm7, %v1709_v33, 0.0 }
 0x200   : > { %1618 = vst.msk [vmem:[%s3259_s15 + $0x14] sm:$0xf] %vm376_vm0, %v2126_v40  ;;  %v1727_v30 = vsel %vm1662_vm7, %v1707_v42, 0.0 }
 0x201   : > { %v1675_v51 = vadd.f32 %v1674_v47, %v1673_v25  ;;  %v1728_v39 = vadd.f32 %v1727_v30, %v1726_v41 }
 0x203   : > { %v1677_v55 = vadd.f32 %v1676_v52, %v1675_v51  ;;  %v1730_v49 = vadd.f32 %v1729_v53, %v1728_v39 }
 0x205   : > { %v1732_v54 = vadd.f32 %v1731_v10, %v1730_v49 }
 0x23e   : > { %v2164_v48 = vpop.f32.mrb[0].mxu1 }
 0x23f   : > { %v2131_v57 = vpack.c.bf16 %v2164_v48, %v2164_v48  ;;  %v1550_v58 = vpop.f32.mrb[1].mxu1  ;;  %v1712_v46 = vmul.f32 %v2164_v48, %v2164_v48  ;;  %v1682_v5 = vsel %vm1662_vm7, %v2164_v48, 0.0 }
 0x240   : > { %v2129_v31 = vpack.c.bf16 %v1550_v58, %v1550_v58  ;;  %v1678_v43 = vsel %vm1662_vm7, %v1550_v58, 0.0  ;;  %v1710_v61 = vmul.f32 %v1550_v58, %v1550_v58  ;;  %v2165_v59 = vpop.f32.mrb[2].mxu1 }
 0x241   : > { %2104 = vst.msk [vmem:[%s3259_s15 + $0x28] sm:$0xf] %vm376_vm0, %v2131_v57  ;;  %v1679_v45 = vadd.f32 %v1678_v43, %v1677_v55  ;;  %v2132_v62 = vpack.c.bf16 %v2165_v59, %v2165_v59  ;;  %v1553_v13 = vpop.f32.mrb[3].mxu1  ;;  %v1713_v7 = vmul.f32 %v2165_v59, %v2165_v59  ;;  %v1684_v15 = vsel %vm1662_vm7, %v2165_v59, 0.0  ;;  %v1791_v43 = vld [vmem:[%s3259_s15] sm:$0xff] (%p2495_p3)   ;;  %v1799_v59 = vld [vmem:[%s3259_s15 + $0x10] sm:$0xff] (%p2495_p3)  }
 0x242   : > { %2102 = vst.msk [vmem:[%s3259_s15 + $0x20] sm:$0xf] %vm376_vm0, %v2129_v31  ;;  %v1733_v34 = vsel %vm1662_vm7, %v1710_v61, 0.0  ;;  %v2130_v63 = vpack.c.bf16 %v1553_v13, %v1553_v13  ;;  %v1680_v0 = vsel %vm1662_vm7, %v1553_v13, 0.0  ;;  %v1711_v29 = vmul.f32 %v1553_v13, %v1553_v13  ;;  %v1795_v61 = vld [vmem:[%s3259_s15 + $0x8] sm:$0xff] (%p2495_p3)   ;;  %1792 = vst [vmem:[%s1775_s8] sm:$0xff] (%p2495_p3), %v1791_v43  }
 0x243   : > { %v1734_v16 = vadd.f32 %v1733_v34, %v1732_v54  ;;  %2105 = vst.msk [vmem:[%s3259_s15 + $0x2c] sm:$0xf] %vm376_vm0, %v2132_v62  ;;  %v1681_v1 = vadd.f32 %v1680_v0, %v1679_v45  ;;  %v1737_v12 = vsel %vm1662_vm7, %v1712_v46, 0.0  ;;  %v1739_v20 = vsel %vm1662_vm7, %v1713_v7, 0.0  ;;  %v1803_v45 = vld [vmem:[%s3259_s15 + $0x18] sm:$0xff] (%p2495_p3)   ;;  %1796 = vst [vmem:[%s1775_s8 + $0x8] sm:$0xff] (%p2495_p3), %v1795_v61  }
 0x244   : > { %2103 = vst.msk [vmem:[%s3259_s15 + $0x24] sm:$0xf] %vm376_vm0, %v2130_v63  ;;  %v1735_v11 = vsel %vm1662_vm7, %v1711_v29, 0.0  ;;  %1800 = vst [vmem:[%s1775_s8 + $0x10] sm:$0xff] (%p2495_p3), %v1799_v59  }
 0x245   : > { %v1683_v6 = vadd.f32 %v1682_v5, %v1681_v1  ;;  %v1736_v2 = vadd.f32 %v1735_v11, %v1734_v16  ;;  %1804 = vst [vmem:[%s1775_s8 + $0x18] sm:$0xff] (%p2495_p3), %v1803_v45  }
 0x247   : > { %v1685_v8 = vadd.f32 %v1684_v15, %v1683_v6  ;;  %v1738_v18 = vadd.f32 %v1737_v12, %v1736_v2 }
 0x249   : > { %v1740_v50 = vadd.f32 %v1739_v20, %v1738_v18 }
 0x24a   : > { %v1811_v13 = vld [vmem:[%s3259_s15 + $0x28] sm:$0xff] (%p2495_p3)  }
 0x24b   : > { %v1807_v62 = vld [vmem:[%s3259_s15 + $0x20] sm:$0xff] (%p2495_p3)   ;;  %1812 = vst [vmem:[%s1775_s8 + $0x48] sm:$0xff] (%p2495_p3), %v1811_v13  }
 0x24c   : > { %1808 = vst [vmem:[%s1775_s8 + $0x40] sm:$0xff] (%p2495_p3), %v1807_v62  }
 0x27a   : > { %v2168_v3 = vpop.f32.mrb[4].mxu1 }
 0x27b   : > { %v2135_v56 = vpack.c.bf16 %v2168_v3, %v2168_v3  ;;  %v1566_v4 = vpop.f32.mrb[5].mxu1  ;;  %v1716_v14 = vmul.f32 %v2168_v3, %v2168_v3  ;;  %v1690_v38 = vsel %vm1662_vm7, %v2168_v3, 0.0 }
 0x27c   : > { %v2133_v21 = vpack.c.bf16 %v1566_v4, %v1566_v4  ;;  %v1686_v22 = vsel %vm1662_vm7, %v1566_v4, 0.0  ;;  %v1714_v26 = vmul.f32 %v1566_v4, %v1566_v4  ;;  %v2169_v27 = vpop.f32.mrb[6].mxu1 }
 0x27d   : > { %2108 = vst.msk [vmem:[%s3259_s15 + $0x38] sm:$0xf] %vm376_vm0, %v2135_v56  ;;  %v1687_v23 = vadd.f32 %v1686_v22, %v1685_v8  ;;  %v2136_v60 = vpack.c.bf16 %v2169_v27, %v2169_v27  ;;  %v1569_v9 = vpop.f32.mrb[7].mxu1  ;;  %v1717_v17 = vmul.f32 %v2169_v27, %v2169_v27  ;;  %v1692_v24 = vsel %vm1662_vm7, %v2169_v27, 0.0 }
 0x27e   : > { %2106 = vst.msk [vmem:[%s3259_s15 + $0x30] sm:$0xf] %vm376_vm0, %v2133_v21  ;;  %v1741_v28 = vsel %vm1662_vm7, %v1714_v26, 0.0  ;;  %v2134_v36 = vpack.c.bf16 %v1569_v9, %v1569_v9  ;;  %v1688_v19 = vsel %vm1662_vm7, %v1569_v9, 0.0  ;;  %v1715_v37 = vmul.f32 %v1569_v9, %v1569_v9 }
 0x27f   : > { %v1742_v32 = vadd.f32 %v1741_v28, %v1740_v50  ;;  %2109 = vst.msk [vmem:[%s3259_s15 + $0x3c] sm:$0xf] %vm376_vm0, %v2136_v60  ;;  %v1689_v44 = vadd.f32 %v1688_v19, %v1687_v23  ;;  %v1745_v25 = vsel %vm1662_vm7, %v1716_v14, 0.0  ;;  %v1747_v33 = vsel %vm1662_vm7, %v1717_v17, 0.0 }
 0x280   : > { %2107 = vst.msk [vmem:[%s3259_s15 + $0x34] sm:$0xf] %vm376_vm0, %v2134_v36  ;;  %v1743_v35 = vsel %vm1662_vm7, %v1715_v37, 0.0  ;;  %vm1700_vm0 = vcmask 24576  }
 0x281   : > { %v1691_v40 = vadd.f32 %v1690_v38, %v1689_v44  ;;  %v1744_v41 = vadd.f32 %v1743_v35, %v1742_v32 }
 0x283   : > { %v1693_v42 = vadd.f32 %v1692_v24, %v1691_v40  ;;  %v1746_v47 = vadd.f32 %v1745_v25, %v1744_v41 }
 0x285   : > { %v1694_v51 = vrot.slane %v1693_v42, 4  ;;  %v1748_v30 = vadd.f32 %v1747_v33, %v1746_v47 }
 0x286   : > { %v1819_v63 = vld [vmem:[%s3259_s15 + $0x38] sm:$0xff] (%p2495_p3)  }
 0x287   : > { %v1695_v52 = vadd.f32 %v1694_v51, %v1693_v42  ;;  %v1749_v39 = vrot.slane %v1748_v30, 4  ;;  %v1815_v34 = vld [vmem:[%s3259_s15 + $0x30] sm:$0xff] (%p2495_p3)   ;;  %1820 = vst [vmem:[%s1775_s8 + $0x58] sm:$0xff] (%p2495_p3), %v1819_v63  }
 0x288   : > { %1816 = vst [vmem:[%s1775_s8 + $0x50] sm:$0xff] (%p2495_p3), %v1815_v34  }
 0x289   : > { %v1696_v53 = vrot.slane %v1695_v52, 2  ;;  %v1750_v55 = vadd.f32 %v1749_v39, %v1748_v30 }
 0x28b   : > { %v1697_v49 = vadd.f32 %v1696_v53, %v1695_v52  ;;  %v1751_v10 = vrot.slane %v1750_v55, 2 }
 0x28d   : > { %v1698_v54 = vrot.slane %v1697_v49, 1  ;;  %v1752_v48 = vadd.f32 %v1751_v10, %v1750_v55  ;;  %1770 = sbr.rel (!%p2495_p3) target bundleno = 660 (0x294), region = 36 }
 0x28f   : > { %v1699_v57 = vadd.f32 %v1698_v54, %v1697_v49  ;;  %v1753_v58 = vrot.slane %v1752_v48, 1 }
 0x291   : > { %1701 = vst.msk [vmem:[%s259_s16] sm:$0x1] %vm1700_vm0, %v1699_v57  ;;  %v1754_v31 = vadd.f32 %v1753_v58, %v1752_v48 }
 0x293   : > { %1755 = vst.msk [vmem:[%s265_s17] sm:$0x1] %vm1700_vm0, %v1754_v31 }
 0x294 PF: > { %s2114_s9 = sshll.u32 %s2389_s22, 1  ;;  %s1886_s15 = sshll.u32 %s259_s16, 4  ;;  %s3352_s15 = int_to_ptr.vmem [resolvable:$true] %s1886_s15 }
 0x295   : > { %s1882_s10 = sadd.s32 %s2385_s21, %s2114_s9  ;;  %s3356_s27 = sshll.u32 %s265_s17, 4  ;;  %s1902_s27 = int_to_ptr.vmem [resolvable:$true] %s3356_s27 }
 0x296   : > { %s2115_s12 = sshll.u32 %s1882_s10, 4  ;;  %s2275_s16 = scalar_lea.vmem %s3352_s15, 16 }
 0x297   : > { %s1884_s14 = scalar_lea.hbm %s3436_s4, %s2115_s12  ;;  %s3364_s22 = scalar_lea.hbm %s3437_s5, %s2115_s12 }
 0x298   : > { %p2276_p13 = scmp.ne.s32.totalorder %s3352_s15, %s2275_s16  ;;  %s2412_s21 = smov [#allocation6]  }
 0x299   : > { %s2279_s9 = sshll.u32 %s2412_s21, 4  ;;  %s2280_s9 = int_to_ptr.vmem [resolvable:$false] %s2279_s9 }
 0x29a   : > { %p2277_p0 = pnand %p2276_p13, %p2495_p3  ;;  %s2281_s10 = scalar_lea.vmem %s2280_s9, 32 }
 0x29b   : > { %p2282_p2 = scmp.lt.s32.totalorder %s3352_s15, %s2280_s9  ;;  %p2283_p4 = scmp.lt.s32.totalorder %s2281_s10, %s2275_s16 }
 0x29c   : > { %p2278_p1 = pneg %p2277_p0 }
 0x29d   : > { %p2284_p5 = por %p2283_p4, %p2282_p2 }
 0x29f   : > { %p2285_p6 = pnand %p2284_p5, %p2278_p1 }
 0x2a1   : > { %2288 = shalt.err (!%p2285_p6)
}
 0x2a2   : > { %s2289_s17 = scalar_lea.hbm %s1884_s14, 16  ;;  %s2293_s12 = scalar_lea.hbm %s3436_s4, 64 }
 0x2a3   : > { %p2290_p7 = scmp.ne.s32.totalorder %s1884_s14, %s2289_s17  ;;  %p2294_p11 = scmp.lt.u32.totalorder %s1884_s14, %s3436_s4 }
 0x2a4   : > { %p2295_p12 = scmp.lt.u32.totalorder %s2293_s12, %s2289_s17  ;;  %p2297_p0 = scmp.lt.u32.totalorder %s2289_s17, %s1884_s14 }
 0x2a5   : > { %p2291_p9 = pnand %p2290_p7, %p2495_p3 }
 0x2a6   : > { %p2296_p13 = por %p2295_p12, %p2294_p11 }
 0x2a7   : > { %p2292_p10 = pneg %p2291_p9 }
 0x2a8   : > { %p2298_p2 = por %p2297_p0, %p2296_p13 }
 0x2aa   : > { %p2299_p1 = pnand %p2298_p2, %p2292_p10 }
 0x2ac   : > { %2302 = shalt.err (!%p2299_p1)
}
 0x2ad   : > { %s3446_s16 = scalar_lea.sflag [#allocation7], %s3204_s13  ;;  %s2303_s21 = scalar_lea.vmem %s1902_s27, 16 }
 0x2ae   : > { %2179 = dma.vmem_to_hbm [thread:$0]  (%p2495_p3), %s3352_s15, 16, %s1884_s14, %s3446_s16  }
 0x2af   : > { %p2304_p4 = scmp.ne.s32.totalorder %s1902_s27, %s2303_s21  ;;  %s2413_s9 = smov [#allocation8]  }
 0x2b0   : > { %s2307_s10 = sshll.u32 %s2413_s9, 4  ;;  %s2308_s10 = int_to_ptr.vmem [resolvable:$false] %s2307_s10 }
 0x2b1   : > { %p2305_p5 = pnand %p2304_p4, %p2495_p3  ;;  %s2309_s17 = scalar_lea.vmem %s2308_s10, 32 }
 0x2b2   : > { %p2310_p7 = scmp.lt.s32.totalorder %s1902_s27, %s2308_s10  ;;  %p2311_p9 = scmp.lt.s32.totalorder %s2309_s17, %s2303_s21 }
 0x2b3   : > { %p2306_p6 = pneg %p2305_p5 }
 0x2b4   : > { %p2312_p10 = por %p2311_p9, %p2310_p7 }
 0x2b6   : > { %p2313_p11 = pnand %p2312_p10, %p2306_p6 }
 0x2b8   : > { %2316 = shalt.err (!%p2313_p11)
}
 0x2b9   : > { %s2317_s15 = scalar_lea.hbm %s3364_s22, 16  ;;  %s2321_s26 = scalar_lea.hbm %s3437_s5, 64 }
 0x2ba   : > { %p2318_p12 = scmp.ne.s32.totalorder %s3364_s22, %s2317_s15  ;;  %p2322_p2 = scmp.lt.u32.totalorder %s3364_s22, %s3437_s5 }
 0x2bb   : > { %p2323_p1 = scmp.lt.u32.totalorder %s2321_s26, %s2317_s15  ;;  %p2325_p5 = scmp.lt.u32.totalorder %s2317_s15, %s3364_s22 }
 0x2bc   : > { %p2319_p13 = pnand %p2318_p12, %p2495_p3 }
 0x2bd   : > { %p2324_p4 = por %p2323_p1, %p2322_p2 }
 0x2be   : > { %p2320_p0 = pneg %p2319_p13 }
 0x2bf   : > { %p2326_p6 = por %p2325_p5, %p2324_p4 }
 0x2c1   : > { %p2327_p7 = pnand %p2326_p6, %p2320_p0 }
 0x2c3   : > { %2330 = shalt.err (!%p2327_p7)
}
 0x2c4   : > { %s3447_s30 = scalar_lea.sflag [#allocation9], %s3204_s13 }
 0x2c5   : > { %2180 = dma.vmem_to_hbm [thread:$0]  (%p2495_p3), %s1902_s27, 16, %s3364_s22, %s3447_s30  }
 0x2c6 PF: > { %p2190_p9 = scmp.ge.s32.totalorder %s2401_s25, 2  ;;  %s1920_s16 = sand.u32 1, %s2373_s18  }
 0x2c7   : > { %s1921_s21 = scalar_lea.sflag [#allocation7], %s1920_s16 }
 0x2c8   : > { %p2184_p10 = pnand %p2190_p9, %p2504_p8 }
 0x2ca   : > { %2364 = dma.done.wait (!%p2184_p10), %s1921_s21, 16  }
 0x2cb   : > { %2366 = vsyncadd (!%p2184_p10), %s1921_s21, 4294967280  ;;  %s1929_s9 = scalar_lea.sflag [#allocation9], %s1920_s16 }
 0x2cc   : > { %2368 = dma.done.wait (!%p2184_p10), %s1929_s9, 16  }
 0x2cd   : > { %2370 = vsyncadd (!%p2184_p10), %s1929_s9, 4294967280  ;;  %s22_s25 = sadd.s32 1, %s2401_s25   ;;  %s3448_s18 = smov %s2377_s19 }
 0x2ce   : > { %p19_p11 = scmp.ge.s32.totalorder %s22_s25, 6   ;;  %s3449_s19 = smov %s2381_s20 }
 0x2cf   : > { %s3450_s20 = smov %s2513_s11  ;;  %s3451_s21 = smov %s2393_s23 }
 0x2d0   : > { %s3452_s22 = smov %s2397_s24  ;;  %s3453_s23 = smov %s3456_s28 }
 0x2d1   : > { %s3454_s24 = smov %s3460_s29  ;;  %21 = sbr.rel (!%p19_p11) target bundleno = 9 (0x9), region = 144 }
 0x2d8   :  { %1933 = vsyncpa [#allocation7], 1 }
 0x2d9   :  { %1935 = vsyncpa [#allocation7 + $0x1], 1 }
 0x2da   :  { %1936 = vsyncpa [#allocation9], 1 }
 0x2db   :  { %1938 = vsyncpa [#allocation9 + $0x1], 1 }

</bundles_post_ra>
